<compile_context>
chip_gen: v7x
topology: tpu7x:2x2x1
jax: 0.10.0
libtpu: 0.0.40
codegen_flags: <defaults>
</compile_context>

<pallas_src>
import functools
import math

import jax
import jax.numpy as jnp
from jax.experimental import pallas as pl
from jax.experimental.pallas import tpu as pltpu


def _layer_norm(v, g, b, eps=1e-6):
    mu = jnp.mean(v, axis=-1, keepdims=True)
    var = jnp.mean((v - mu) ** 2, axis=-1, keepdims=True)
    return (v - mu) * jax.lax.rsqrt(var + eps) * g + b


def encoder_layer_kernel(x_ref, bias_ref,
                         ln1_g_ref, ln1_b_ref,
                         wq_ref, bq_ref, wk_ref, bk_ref, wv_ref, bv_ref,
                         wo_ref, bo_ref,
                         ln2_g_ref, ln2_b_ref,
                         w1_ref, b1_ref, w2_ref, b2_ref,
                         out_ref,
                         res_ref, rn_ref, acc_ref, ctx_ref,
                         *, heads):
    f = pl.program_id(1)
    bf16 = jnp.bfloat16
    f32 = jnp.float32
    Bt, S, D = x_ref.shape
    dh = D // heads

    # ---- attention + scratch init: only on the first d_ff chunk -------------
    @pl.when(f == 0)
    def _attention():
        x = x_ref[...].reshape(Bt * S, D)                       # (Bt*S, D) f32
        xn = _layer_norm(x, ln1_g_ref[0], ln1_b_ref[0]).astype(bf16)

        # Full-width projections: one (Bt*S, D) @ (D, D) matmul each.
        def proj(w_ref, b_ref):
            return jnp.dot(xn, w_ref[...],
                           preferred_element_type=f32) + b_ref[0]

        q = (proj(wq_ref, bq_ref) * (1.0 / math.sqrt(dh))).astype(bf16)
        k = proj(wk_ref, bk_ref).astype(bf16)
        v = proj(wv_ref, bv_ref).astype(bf16)

        # Scores / softmax / context are intrinsically head-sized (K=dh, N=dh);
        # loop over the small batch tile and heads with static lane slices and
        # plain 2-D matmuls (no transposes, no head-split weights).
        for b in range(Bt):
            rows = slice(b * S, (b + 1) * S)
            bias_b = bias_ref[b].astype(f32)                    # (S, S)
            for h in range(heads):
                cols = slice(h * dh, (h + 1) * dh)
                q_bh = q[rows, cols]                            # (S, dh) bf16
                k_bh = k[rows, cols]
                v_bh = v[rows, cols]
                s = jax.lax.dot_general(                        # q @ k.T
                    q_bh, k_bh, (((1,), (1,)), ((), ())),
                    preferred_element_type=f32)                 # (S, S) f32
                s = s + bias_b
                s = s - jnp.max(s, axis=-1, keepdims=True)
                p = jnp.exp(s)
                p = p * pl.reciprocal(jnp.sum(p, axis=-1, keepdims=True),
                                      approx=True)
                ctx_ref[rows, cols] = jnp.dot(
                    p.astype(bf16), v_bh,
                    preferred_element_type=f32).astype(bf16)

        # Full-width output projection: one (Bt*S, D) @ (D, D) matmul.
        attn = jnp.dot(ctx_ref[...], wo_ref[...],
                       preferred_element_type=f32) + bo_ref[0]

        # TODO(synk): dropout is identity (eval mode).
        res = attn + x
        res_ref[...] = res
        rn_ref[...] = _layer_norm(res, ln2_g_ref[0], ln2_b_ref[0]).astype(bf16)
        acc_ref[...] = jnp.zeros_like(acc_ref)

    # ---- positionwise FFN, streamed over d_ff chunks -------------------------
    hidden = jnp.maximum(
        jnp.dot(rn_ref[...], w1_ref[...],
                preferred_element_type=f32) + b1_ref[0], 0.0)
    acc_ref[...] += jnp.dot(hidden.astype(bf16), w2_ref[...],
                            preferred_element_type=f32)

    @pl.when(f == pl.num_programs(1) - 1)
    def _finalize():
        out_ref[...] = (acc_ref[...] + b2_ref[0]
                        + res_ref[...]).reshape(Bt, S, D)


def s_transformer_encoder_layer(x, mask, params, heads, *,
                                batch_tile=None, ff_tile=None):
    B, S, D = x.shape
    if D % heads != 0:
        raise ValueError("d_model must be divisible by heads")
    d_ff = params["w1"].shape[1]
    bf16, f32 = jnp.bfloat16, jnp.float32

    # ---- generation-aware tiling (VMEM capacity query) -----------------------
    try:
        vmem_cap = int(pltpu.get_tpu_info().vmem_capacity_bytes)
    except Exception:
        vmem_cap = 64 * 1024 * 1024          # conservative (v7x) fallback
    budget = vmem_cap // 2

    def est_bytes(bt, tf):
        m = bt * S
        w_qkv = 2 * 4 * D * D * 2                        # bf16, double-buffered
        w_ffn = 2 * ((D * tf + tf * D) * 2 + tf * 4)     # w1/w2 chunks + b1
        io = 2 * (2 * bt * S * D * 4 + bt * S * S * 2)   # x/out f32, mask bf16
        scratch = m * D * (4 + 2 + 4 + 2)                # res, rn, acc, ctx
        temps = 4 * m * D * 4 + m * tf * 4 + 3 * S * S * 4
        return w_qkv + w_ffn + io + scratch + temps

    if batch_tile is None:
        batch_tile = 1
        for cand in range(1, B + 1):
            if (B % cand == 0 and cand * S <= 1024
                    and est_bytes(cand, min(d_ff, 512)) <= budget):
                batch_tile = cand
    bt = batch_tile

    if ff_tile is None:
        cands = [d_ff] + [t for t in range((d_ff // 128) * 128, 0, -128)
                          if d_ff % t == 0]
        tf = cands[-1]
        for t in cands:                       # prefer fully resident FFN weights
            if est_bytes(bt, t) <= budget:
                tf = t
                break
    else:
        tf = ff_tile
    nf = d_ff // tf
    nb = B // bt

    # ---- parameter casting ----------------------------------------------------
    wq = params["wq"].astype(bf16)
    wk = params["wk"].astype(bf16)
    wv = params["wv"].astype(bf16)
    wo = params["wo"].astype(bf16)
    w1 = params["w1"].astype(bf16)
    w2 = params["w2"].astype(bf16)
    # additive attention bias (bf16: half the DMA of the int32 mask)
    mask_bias = jnp.where(mask != 0, jnp.float32(-1e18),
                          jnp.float32(0.0)).astype(bf16)

    def const(shape):
        n = len(shape)
        return pl.BlockSpec(shape, lambda b, f, _n=n: (0,) * _n)

    in_specs = [
        pl.BlockSpec((bt, S, D), lambda b, f: (b, 0, 0)),   # x
        pl.BlockSpec((bt, S, S), lambda b, f: (b, 0, 0)),   # mask bias
        const((1, D)), const((1, D)),                       # ln1 gamma / beta
        const((D, D)), const((1, D)),                       # wq, bq
        const((D, D)), const((1, D)),                       # wk, bk
        const((D, D)), const((1, D)),                       # wv, bv
        const((D, D)), const((1, D)),                       # wo, bo
        const((1, D)), const((1, D)),                       # ln2 gamma / beta
        pl.BlockSpec((D, tf), lambda b, f: (0, f)),         # w1 chunk
        pl.BlockSpec((1, tf), lambda b, f: (0, f)),         # b1 chunk
        pl.BlockSpec((tf, D), lambda b, f: (f, 0)),         # w2 chunk
        const((1, D)),                                      # b2
    ]

    grid_spec = pltpu.PrefetchScalarGridSpec(
        num_scalar_prefetch=0,
        grid=(nb, nf),
        in_specs=in_specs,
        out_specs=pl.BlockSpec((bt, S, D), lambda b, f: (b, 0, 0)),
        scratch_shapes=[
            pltpu.VMEM((bt * S, D), f32),    # attention residual
            pltpu.VMEM((bt * S, D), bf16),   # pre-FFN LayerNorm (matmul operand)
            pltpu.VMEM((bt * S, D), f32),    # FFN accumulator
            pltpu.VMEM((bt * S, D), bf16),   # attention context staging
        ],
    )

    kernel = functools.partial(encoder_layer_kernel, heads=heads)

    return pl.pallas_call(
        kernel,
        out_shape=jax.ShapeDtypeStruct((B, S, D), f32),
        grid_spec=grid_spec,
        compiler_params=pltpu.CompilerParams(
            dimension_semantics=("parallel", "arbitrary"),
            vmem_limit_bytes=max(32 * 1024 * 1024, int(0.7 * vmem_cap))),
    )(x, mask_bias,
      params["ln1_g"], params["ln1_b"],
      wq, params["bq"], wk, params["bk"], wv, params["bv"],
      wo, params["bo"],
      params["ln2_g"], params["ln2_b"],
      w1, params["b1"], w2, params["b2"])


# ---- plain-JAX reference (same math, bf16 matmul operands / f32 accum) ------
def reference(x, mask, params, heads):
    B, S, D = x.shape
    dh = D // heads
    bf16 = jnp.bfloat16

    def ln(v, g, b):
        mu = jnp.mean(v, -1, keepdims=True)
        var = jnp.mean((v - mu) ** 2, -1, keepdims=True)
        return (v - mu) / jnp.sqrt(var + 1e-6) * g + b

    def mm(a, b):
        return jnp.matmul(a.astype(bf16), b.astype(bf16),
                          preferred_element_type=jnp.float32)

    xn = ln(x, params["ln1_g"][0], params["ln1_b"][0])
    q = mm(xn, params["wq"]) + params["bq"][0]
    k = mm(xn, params["wk"]) + params["bk"][0]
    v = mm(xn, params["wv"]) + params["bv"][0]
    q = q.reshape(B, S, heads, dh).transpose(0, 2, 1, 3) / math.sqrt(dh)
    k = k.reshape(B, S, heads, dh).transpose(0, 2, 1, 3)
    v = v.reshape(B, S, heads, dh).transpose(0, 2, 1, 3)
    scores = jnp.einsum("bhqd,bhkd->bhqk", q.astype(bf16), k.astype(bf16),
                        preferred_element_type=jnp.float32)
    scores = jnp.where(mask[:, None] != 0, jnp.float32(-1e18), scores)
    p = jax.nn.softmax(scores, axis=-1)
    ctx = jnp.einsum("bhqk,bhkd->bhqd", p.astype(bf16), v.astype(bf16),
                     preferred_element_type=jnp.float32)
    ctx = ctx.transpose(0, 2, 1, 3).reshape(B, S, D)
    attn_out = mm(ctx, params["wo"]) + params["bo"][0]
    res = attn_out + x
    rn = ln(res, params["ln2_g"][0], params["ln2_b"][0])
    hidden = jnp.maximum(mm(rn, params["w1"]) + params["b1"][0], 0.0)
    return mm(hidden, params["w2"]) + params["b2"][0] + res


if __name__ == "__main__":
    # small but lane-friendly shapes (D, d_ff multiples of 128)
    B, S, D, H, D_FF = 2, 16, 128, 4, 256

    key = jax.random.PRNGKey(0)
    ks = jax.random.split(key, 16)

    def w(k, shape, scale=0.05):
        return (scale * jax.random.normal(k, shape)).astype(jnp.float32)

    params = {
        "ln1_g": jnp.ones((1, D), jnp.float32),
        "ln1_b": jnp.zeros((1, D), jnp.float32),
        "wq": w(ks[0], (D, D)), "bq": w(ks[1], (1, D)),
        "wk": w(ks[2], (D, D)), "bk": w(ks[3], (1, D)),
        "wv": w(ks[4], (D, D)), "bv": w(ks[5], (1, D)),
        "wo": w(ks[6], (D, D)), "bo": w(ks[7], (1, D)),
        "ln2_g": jnp.ones((1, D), jnp.float32),
        "ln2_b": jnp.zeros((1, D), jnp.float32),
        "w1": w(ks[8], (D, D_FF)), "b1": w(ks[9], (1, D_FF)),
        "w2": w(ks[10], (D_FF, D)), "b2": w(ks[11], (1, D)),
    }

    x = jax.random.normal(ks[12], (B, S, D), dtype=jnp.float32)
    # mask[b, q, k] != 0 => key position k is masked for query q
    # (emulate padding: last 3 key positions of batch 1 are padding).
    mask = jnp.zeros((B, S, S), jnp.int32)
    mask = mask.at[1, :, S - 3:].set(1)

    out = s_transformer_encoder_layer(x, mask, params, H)
    out = jax.block_until_ready(out)

    ref = reference(x, mask, params, H)
    assert out.shape == (B, S, D)
    max_err = float(jnp.max(jnp.abs(out - ref)))
    assert jnp.allclose(out, ref, rtol=2e-2, atol=2e-2), \
        f"mismatch vs reference (max abs err {max_err})"

    print("KERNEL_OK")
</pallas_src>

<mosaic_0001>
module attributes {stable_mosaic.version = 11 : i64} {
  func.func @encoder_layer_kernel(%arg0: i32, %arg1: i32, %arg2: memref<2x16x128xf32, #tpu.memory_space<vmem>>, %arg3: memref<2x16x16xbf16, #tpu.memory_space<vmem>>, %arg4: memref<1x128xf32, #tpu.memory_space<vmem>>, %arg5: memref<1x128xf32, #tpu.memory_space<vmem>>, %arg6: memref<128x128xbf16, #tpu.memory_space<vmem>>, %arg7: memref<1x128xf32, #tpu.memory_space<vmem>>, %arg8: memref<128x128xbf16, #tpu.memory_space<vmem>>, %arg9: memref<1x128xf32, #tpu.memory_space<vmem>>, %arg10: memref<128x128xbf16, #tpu.memory_space<vmem>>, %arg11: memref<1x128xf32, #tpu.memory_space<vmem>>, %arg12: memref<128x128xbf16, #tpu.memory_space<vmem>>, %arg13: memref<1x128xf32, #tpu.memory_space<vmem>>, %arg14: memref<1x128xf32, #tpu.memory_space<vmem>>, %arg15: memref<1x128xf32, #tpu.memory_space<vmem>>, %arg16: memref<128x256xbf16, #tpu.memory_space<vmem>>, %arg17: memref<1x256xf32, #tpu.memory_space<vmem>>, %arg18: memref<256x128xbf16, #tpu.memory_space<vmem>>, %arg19: memref<1x128xf32, #tpu.memory_space<vmem>>, %arg20: memref<2x16x128xf32, #tpu.memory_space<vmem>>, %arg21: memref<32x128xf32, #tpu.memory_space<vmem>>, %arg22: memref<32x128xbf16, #tpu.memory_space<vmem>>, %arg23: memref<32x128xf32, #tpu.memory_space<vmem>>, %arg24: memref<32x128xbf16, #tpu.memory_space<vmem>>) attributes {dimension_semantics = [#tpu.dimension_semantics<parallel>, #tpu.dimension_semantics<arbitrary>], iteration_bounds = array<i64: 1, 1>, scalar_prefetch = 0 : i64, scratch_operands = 4 : i64, tpu.core_type = #tpu.core_type<tc>, window_params = [{transform_indices = @transform_0, window_bounds = array<i64: 2, 16, 128>}, {transform_indices = @transform_1, window_bounds = array<i64: 2, 16, 16>}, {pipeline_mode = #tpu.pipeline_mode<synchronous>, transform_indices = @transform_2, window_bounds = array<i64: 1, 128>}, {pipeline_mode = #tpu.pipeline_mode<synchronous>, transform_indices = @transform_3, window_bounds = array<i64: 1, 128>}, {pipeline_mode = #tpu.pipeline_mode<synchronous>, transform_indices = @transform_4, window_bounds = array<i64: 128, 128>}, {pipeline_mode = #tpu.pipeline_mode<synchronous>, transform_indices = @transform_5, window_bounds = array<i64: 1, 128>}, {pipeline_mode = #tpu.pipeline_mode<synchronous>, transform_indices = @transform_6, window_bounds = array<i64: 128, 128>}, {pipeline_mode = #tpu.pipeline_mode<synchronous>, transform_indices = @transform_7, window_bounds = array<i64: 1, 128>}, {pipeline_mode = #tpu.pipeline_mode<synchronous>, transform_indices = @transform_8, window_bounds = array<i64: 128, 128>}, {pipeline_mode = #tpu.pipeline_mode<synchronous>, transform_indices = @transform_9, window_bounds = array<i64: 1, 128>}, {pipeline_mode = #tpu.pipeline_mode<synchronous>, transform_indices = @transform_10, window_bounds = array<i64: 128, 128>}, {pipeline_mode = #tpu.pipeline_mode<synchronous>, transform_indices = @transform_11, window_bounds = array<i64: 1, 128>}, {pipeline_mode = #tpu.pipeline_mode<synchronous>, transform_indices = @transform_12, window_bounds = array<i64: 1, 128>}, {pipeline_mode = #tpu.pipeline_mode<synchronous>, transform_indices = @transform_13, window_bounds = array<i64: 1, 128>}, {transform_indices = @transform_14, window_bounds = array<i64: 128, 256>}, {transform_indices = @transform_15, window_bounds = array<i64: 1, 256>}, {transform_indices = @transform_16, window_bounds = array<i64: 256, 128>}, {pipeline_mode = #tpu.pipeline_mode<synchronous>, transform_indices = @transform_17, window_bounds = array<i64: 1, 128>}, {transform_indices = @transform_18, window_bounds = array<i64: 2, 16, 128>}]} {
    %c0_i32 = arith.constant 0 : i32
    %0 = arith.cmpi eq, %arg1, %c0_i32 : i32
    %1 = arith.extui %0 : i1 to i32
    %c0_i32_0 = arith.constant 0 : i32
    %2 = arith.cmpi ne, %1, %c0_i32_0 : i32
    scf.if %2 {
      %c0_16 = arith.constant 0 : index
      %c0_17 = arith.constant 0 : index
      %c0_18 = arith.constant 0 : index
      %22 = vector.load %arg2[%c0_16, %c0_17, %c0_18] : memref<2x16x128xf32, #tpu.memory_space<vmem>>, vector<2x16x128xf32>
      %23 = vector.shape_cast %22 : vector<2x16x128xf32> to vector<32x128xf32>
      %c0_19 = arith.constant 0 : index
      %c0_20 = arith.constant 0 : index
      %24 = vector.load %arg4[%c0_19, %c0_20] : memref<1x128xf32, #tpu.memory_space<vmem>>, vector<1x128xf32>
      %25 = vector.shape_cast %24 : vector<1x128xf32> to vector<128xf32>
      %c0_21 = arith.constant 0 : index
      %c0_22 = arith.constant 0 : index
      %26 = vector.load %arg5[%c0_21, %c0_22] : memref<1x128xf32, #tpu.memory_space<vmem>>, vector<1x128xf32>
      %27 = vector.shape_cast %26 : vector<1x128xf32> to vector<128xf32>
      %cst_23 = arith.constant dense<0.000000e+00> : vector<32xf32>
      %28 = vector.multi_reduction <add>, %23, %cst_23 [1] : vector<32x128xf32> to vector<32xf32>
      %29 = vector.shape_cast %28 : vector<32xf32> to vector<32x1xf32>
      %cst_24 = arith.constant 1.280000e+02 : f32
      %30 = vector.broadcast %cst_24 : f32 to vector<32x1xf32>
      %31 = arith.divf %29, %30 : vector<32x1xf32>
      %32 = vector.broadcast %31 : vector<32x1xf32> to vector<32x128xf32>
      %33 = arith.subf %23, %32 : vector<32x128xf32>
      %34 = arith.mulf %33, %33 : vector<32x128xf32>
      %cst_25 = arith.constant dense<0.000000e+00> : vector<32xf32>
      %35 = vector.multi_reduction <add>, %34, %cst_25 [1] : vector<32x128xf32> to vector<32xf32>
      %36 = vector.shape_cast %35 : vector<32xf32> to vector<32x1xf32>
      %cst_26 = arith.constant 1.280000e+02 : f32
      %37 = vector.broadcast %cst_26 : f32 to vector<32x1xf32>
      %38 = arith.divf %36, %37 : vector<32x1xf32>
      %39 = vector.broadcast %31 : vector<32x1xf32> to vector<32x128xf32>
      %40 = arith.subf %23, %39 : vector<32x128xf32>
      %cst_27 = arith.constant 9.99999997E-7 : f32
      %41 = vector.broadcast %cst_27 : f32 to vector<32x1xf32>
      %42 = arith.addf %38, %41 : vector<32x1xf32>
      %43 = math.rsqrt %42 : vector<32x1xf32>
      %44 = vector.broadcast %43 : vector<32x1xf32> to vector<32x128xf32>
      %45 = arith.mulf %40, %44 : vector<32x128xf32>
      %46 = vector.shape_cast %25 : vector<128xf32> to vector<1x128xf32>
      %47 = vector.broadcast %46 : vector<1x128xf32> to vector<32x128xf32>
      %48 = arith.mulf %45, %47 : vector<32x128xf32>
      %49 = vector.shape_cast %27 : vector<128xf32> to vector<1x128xf32>
      %50 = vector.broadcast %49 : vector<1x128xf32> to vector<32x128xf32>
      %51 = arith.addf %48, %50 : vector<32x128xf32>
      %52 = arith.truncf %51 : vector<32x128xf32> to vector<32x128xbf16>
      %c0_28 = arith.constant 0 : index
      %c0_29 = arith.constant 0 : index
      %53 = vector.load %arg6[%c0_28, %c0_29] : memref<128x128xbf16, #tpu.memory_space<vmem>>, vector<128x128xbf16>
      %cst_30 = arith.constant dense<0.000000e+00> : vector<32x128xf32>
      %54 = tpu.matmul %52, %53, %cst_30 {dimension_numbers = #tpu.dot_dimension_numbers<[1], [0], [0], [1], [0, 0, 1, 1], [], []>} : vector<32x128xbf16>, vector<128x128xbf16>, vector<32x128xf32> -> vector<32x128xf32>
      %c0_31 = arith.constant 0 : index
      %c0_32 = arith.constant 0 : index
      %55 = vector.load %arg7[%c0_31, %c0_32] : memref<1x128xf32, #tpu.memory_space<vmem>>, vector<1x128xf32>
      %56 = vector.shape_cast %55 : vector<1x128xf32> to vector<128xf32>
      %57 = vector.shape_cast %56 : vector<128xf32> to vector<1x128xf32>
      %58 = vector.broadcast %57 : vector<1x128xf32> to vector<32x128xf32>
      %59 = arith.addf %54, %58 : vector<32x128xf32>
      %cst_33 = arith.constant 0.176776692 : f32
      %60 = vector.broadcast %cst_33 : f32 to vector<32x128xf32>
      %61 = arith.mulf %59, %60 : vector<32x128xf32>
      %62 = arith.truncf %61 : vector<32x128xf32> to vector<32x128xbf16>
      %c0_34 = arith.constant 0 : index
      %c0_35 = arith.constant 0 : index
      %63 = vector.load %arg8[%c0_34, %c0_35] : memref<128x128xbf16, #tpu.memory_space<vmem>>, vector<128x128xbf16>
      %cst_36 = arith.constant dense<0.000000e+00> : vector<32x128xf32>
      %64 = tpu.matmul %52, %63, %cst_36 {dimension_numbers = #tpu.dot_dimension_numbers<[1], [0], [0], [1], [0, 0, 1, 1], [], []>} : vector<32x128xbf16>, vector<128x128xbf16>, vector<32x128xf32> -> vector<32x128xf32>
      %c0_37 = arith.constant 0 : index
      %c0_38 = arith.constant 0 : index
      %65 = vector.load %arg9[%c0_37, %c0_38] : memref<1x128xf32, #tpu.memory_space<vmem>>, vector<1x128xf32>
      %66 = vector.shape_cast %65 : vector<1x128xf32> to vector<128xf32>
      %67 = vector.shape_cast %66 : vector<128xf32> to vector<1x128xf32>
      %68 = vector.broadcast %67 : vector<1x128xf32> to vector<32x128xf32>
      %69 = arith.addf %64, %68 : vector<32x128xf32>
      %70 = arith.truncf %69 : vector<32x128xf32> to vector<32x128xbf16>
      %c0_39 = arith.constant 0 : index
      %c0_40 = arith.constant 0 : index
      %71 = vector.load %arg10[%c0_39, %c0_40] : memref<128x128xbf16, #tpu.memory_space<vmem>>, vector<128x128xbf16>
      %cst_41 = arith.constant dense<0.000000e+00> : vector<32x128xf32>
      %72 = tpu.matmul %52, %71, %cst_41 {dimension_numbers = #tpu.dot_dimension_numbers<[1], [0], [0], [1], [0, 0, 1, 1], [], []>} : vector<32x128xbf16>, vector<128x128xbf16>, vector<32x128xf32> -> vector<32x128xf32>
      %c0_42 = arith.constant 0 : index
      %c0_43 = arith.constant 0 : index
      %73 = vector.load %arg11[%c0_42, %c0_43] : memref<1x128xf32, #tpu.memory_space<vmem>>, vector<1x128xf32>
      %74 = vector.shape_cast %73 : vector<1x128xf32> to vector<128xf32>
      %75 = vector.shape_cast %74 : vector<128xf32> to vector<1x128xf32>
      %76 = vector.broadcast %75 : vector<1x128xf32> to vector<32x128xf32>
      %77 = arith.addf %72, %76 : vector<32x128xf32>
      %78 = arith.truncf %77 : vector<32x128xf32> to vector<32x128xbf16>
      %c0_44 = arith.constant 0 : index
      %c0_45 = arith.constant 0 : index
      %c0_46 = arith.constant 0 : index
      %79 = vector.load %arg3[%c0_44, %c0_45, %c0_46] : memref<2x16x16xbf16, #tpu.memory_space<vmem>>, vector<1x16x16xbf16>
      %80 = vector.shape_cast %79 : vector<1x16x16xbf16> to vector<16x16xbf16>
      %81 = arith.extf %80 : vector<16x16xbf16> to vector<16x16xf32>
      %82 = vector.extract_strided_slice %62 {offsets = [0, 0], sizes = [16, 32], strides = [1, 1]} : vector<32x128xbf16> to vector<16x32xbf16>
      %83 = vector.extract_strided_slice %70 {offsets = [0, 0], sizes = [16, 32], strides = [1, 1]} : vector<32x128xbf16> to vector<16x32xbf16>
      %84 = vector.extract_strided_slice %78 {offsets = [0, 0], sizes = [16, 32], strides = [1, 1]} : vector<32x128xbf16> to vector<16x32xbf16>
      %cst_47 = arith.constant dense<0.000000e+00> : vector<16x16xf32>
      %85 = tpu.matmul %82, %83, %cst_47 {dimension_numbers = #tpu.dot_dimension_numbers<[1], [1], [0], [0], [0, 0, 1, 0], [], []>} : vector<16x32xbf16>, vector<16x32xbf16>, vector<16x16xf32> -> vector<16x16xf32>
      %86 = arith.addf %85, %81 : vector<16x16xf32>
      %cst_48 = arith.constant dense<0xFF800000> : vector<16xf32>
      %87 = vector.multi_reduction <maximumf>, %86, %cst_48 [1] : vector<16x16xf32> to vector<16xf32>
      %88 = vector.shape_cast %87 : vector<16xf32> to vector<16x1xf32>
      %89 = vector.broadcast %88 : vector<16x1xf32> to vector<16x16xf32>
      %90 = arith.subf %86, %89 : vector<16x16xf32>
      %91 = math.exp %90 : vector<16x16xf32>
      %cst_49 = arith.constant dense<0.000000e+00> : vector<16xf32>
      %92 = vector.multi_reduction <add>, %91, %cst_49 [1] : vector<16x16xf32> to vector<16xf32>
      %93 = vector.shape_cast %92 : vector<16xf32> to vector<16x1xf32>
      %94 = tpu.reciprocal %93 {approx = true} : vector<16x1xf32> -> vector<16x1xf32>
      %95 = vector.broadcast %94 : vector<16x1xf32> to vector<16x16xf32>
      %96 = arith.mulf %91, %95 : vector<16x16xf32>
      %97 = arith.truncf %96 : vector<16x16xf32> to vector<16x16xbf16>
      %cst_50 = arith.constant dense<0.000000e+00> : vector<16x32xf32>
      %98 = tpu.matmul %97, %84, %cst_50 {dimension_numbers = #tpu.dot_dimension_numbers<[1], [0], [0], [1], [0, 0, 1, 1], [], []>} : vector<16x16xbf16>, vector<16x32xbf16>, vector<16x32xf32> -> vector<16x32xf32>
      %99 = arith.truncf %98 : vector<16x32xf32> to vector<16x32xbf16>
      %c0_51 = arith.constant 0 : index
      %c0_52 = arith.constant 0 : index
      %100 = vector.load %arg24[%c0_51, %c0_52] : memref<32x128xbf16, #tpu.memory_space<vmem>>, vector<16x32xbf16>
      tpu.vector_store %arg24[%c0_51, %c0_52], %99 {strides = array<i32>} : memref<32x128xbf16, #tpu.memory_space<vmem>>, vector<16x32xbf16>,
      %101 = vector.extract_strided_slice %62 {offsets = [0, 32], sizes = [16, 32], strides = [1, 1]} : vector<32x128xbf16> to vector<16x32xbf16>
      %102 = vector.extract_strided_slice %70 {offsets = [0, 32], sizes = [16, 32], strides = [1, 1]} : vector<32x128xbf16> to vector<16x32xbf16>
      %103 = vector.extract_strided_slice %78 {offsets = [0, 32], sizes = [16, 32], strides = [1, 1]} : vector<32x128xbf16> to vector<16x32xbf16>
      %cst_53 = arith.constant dense<0.000000e+00> : vector<16x16xf32>
      %104 = tpu.matmul %101, %102, %cst_53 {dimension_numbers = #tpu.dot_dimension_numbers<[1], [1], [0], [0], [0, 0, 1, 0], [], []>} : vector<16x32xbf16>, vector<16x32xbf16>, vector<16x16xf32> -> vector<16x16xf32>
      %105 = arith.addf %104, %81 : vector<16x16xf32>
      %cst_54 = arith.constant dense<0xFF800000> : vector<16xf32>
      %106 = vector.multi_reduction <maximumf>, %105, %cst_54 [1] : vector<16x16xf32> to vector<16xf32>
      %107 = vector.shape_cast %106 : vector<16xf32> to vector<16x1xf32>
      %108 = vector.broadcast %107 : vector<16x1xf32> to vector<16x16xf32>
      %109 = arith.subf %105, %108 : vector<16x16xf32>
      %110 = math.exp %109 : vector<16x16xf32>
      %cst_55 = arith.constant dense<0.000000e+00> : vector<16xf32>
      %111 = vector.multi_reduction <add>, %110, %cst_55 [1] : vector<16x16xf32> to vector<16xf32>
      %112 = vector.shape_cast %111 : vector<16xf32> to vector<16x1xf32>
      %113 = tpu.reciprocal %112 {approx = true} : vector<16x1xf32> -> vector<16x1xf32>
      %114 = vector.broadcast %113 : vector<16x1xf32> to vector<16x16xf32>
      %115 = arith.mulf %110, %114 : vector<16x16xf32>
      %116 = arith.truncf %115 : vector<16x16xf32> to vector<16x16xbf16>
      %cst_56 = arith.constant dense<0.000000e+00> : vector<16x32xf32>
      %117 = tpu.matmul %116, %103, %cst_56 {dimension_numbers = #tpu.dot_dimension_numbers<[1], [0], [0], [1], [0, 0, 1, 1], [], []>} : vector<16x16xbf16>, vector<16x32xbf16>, vector<16x32xf32> -> vector<16x32xf32>
      %118 = arith.truncf %117 : vector<16x32xf32> to vector<16x32xbf16>
      %c0_57 = arith.constant 0 : index
      %c32 = arith.constant 32 : index
      %119 = vector.load %arg24[%c0_57, %c32] : memref<32x128xbf16, #tpu.memory_space<vmem>>, vector<16x32xbf16>
      tpu.vector_store %arg24[%c0_57, %c32], %118 {strides = array<i32>} : memref<32x128xbf16, #tpu.memory_space<vmem>>, vector<16x32xbf16>,
      %120 = vector.extract_strided_slice %62 {offsets = [0, 64], sizes = [16, 32], strides = [1, 1]} : vector<32x128xbf16> to vector<16x32xbf16>
      %121 = vector.extract_strided_slice %70 {offsets = [0, 64], sizes = [16, 32], strides = [1, 1]} : vector<32x128xbf16> to vector<16x32xbf16>
      %122 = vector.extract_strided_slice %78 {offsets = [0, 64], sizes = [16, 32], strides = [1, 1]} : vector<32x128xbf16> to vector<16x32xbf16>
      %cst_58 = arith.constant dense<0.000000e+00> : vector<16x16xf32>
      %123 = tpu.matmul %120, %121, %cst_58 {dimension_numbers = #tpu.dot_dimension_numbers<[1], [1], [0], [0], [0, 0, 1, 0], [], []>} : vector<16x32xbf16>, vector<16x32xbf16>, vector<16x16xf32> -> vector<16x16xf32>
      %124 = arith.addf %123, %81 : vector<16x16xf32>
      %cst_59 = arith.constant dense<0xFF800000> : vector<16xf32>
      %125 = vector.multi_reduction <maximumf>, %124, %cst_59 [1] : vector<16x16xf32> to vector<16xf32>
      %126 = vector.shape_cast %125 : vector<16xf32> to vector<16x1xf32>
      %127 = vector.broadcast %126 : vector<16x1xf32> to vector<16x16xf32>
      %128 = arith.subf %124, %127 : vector<16x16xf32>
      %129 = math.exp %128 : vector<16x16xf32>
      %cst_60 = arith.constant dense<0.000000e+00> : vector<16xf32>
      %130 = vector.multi_reduction <add>, %129, %cst_60 [1] : vector<16x16xf32> to vector<16xf32>
      %131 = vector.shape_cast %130 : vector<16xf32> to vector<16x1xf32>
      %132 = tpu.reciprocal %131 {approx = true} : vector<16x1xf32> -> vector<16x1xf32>
      %133 = vector.broadcast %132 : vector<16x1xf32> to vector<16x16xf32>
      %134 = arith.mulf %129, %133 : vector<16x16xf32>
      %135 = arith.truncf %134 : vector<16x16xf32> to vector<16x16xbf16>
      %cst_61 = arith.constant dense<0.000000e+00> : vector<16x32xf32>
      %136 = tpu.matmul %135, %122, %cst_61 {dimension_numbers = #tpu.dot_dimension_numbers<[1], [0], [0], [1], [0, 0, 1, 1], [], []>} : vector<16x16xbf16>, vector<16x32xbf16>, vector<16x32xf32> -> vector<16x32xf32>
      %137 = arith.truncf %136 : vector<16x32xf32> to vector<16x32xbf16>
      %c0_62 = arith.constant 0 : index
      %c64 = arith.constant 64 : index
      %138 = vector.load %arg24[%c0_62, %c64] : memref<32x128xbf16, #tpu.memory_space<vmem>>, vector<16x32xbf16>
      tpu.vector_store %arg24[%c0_62, %c64], %137 {strides = array<i32>} : memref<32x128xbf16, #tpu.memory_space<vmem>>, vector<16x32xbf16>,
      %139 = vector.extract_strided_slice %62 {offsets = [0, 96], sizes = [16, 32], strides = [1, 1]} : vector<32x128xbf16> to vector<16x32xbf16>
      %140 = vector.extract_strided_slice %70 {offsets = [0, 96], sizes = [16, 32], strides = [1, 1]} : vector<32x128xbf16> to vector<16x32xbf16>
      %141 = vector.extract_strided_slice %78 {offsets = [0, 96], sizes = [16, 32], strides = [1, 1]} : vector<32x128xbf16> to vector<16x32xbf16>
      %cst_63 = arith.constant dense<0.000000e+00> : vector<16x16xf32>
      %142 = tpu.matmul %139, %140, %cst_63 {dimension_numbers = #tpu.dot_dimension_numbers<[1], [1], [0], [0], [0, 0, 1, 0], [], []>} : vector<16x32xbf16>, vector<16x32xbf16>, vector<16x16xf32> -> vector<16x16xf32>
      %143 = arith.addf %142, %81 : vector<16x16xf32>
      %cst_64 = arith.constant dense<0xFF800000> : vector<16xf32>
      %144 = vector.multi_reduction <maximumf>, %143, %cst_64 [1] : vector<16x16xf32> to vector<16xf32>
      %145 = vector.shape_cast %144 : vector<16xf32> to vector<16x1xf32>
      %146 = vector.broadcast %145 : vector<16x1xf32> to vector<16x16xf32>
      %147 = arith.subf %143, %146 : vector<16x16xf32>
      %148 = math.exp %147 : vector<16x16xf32>
      %cst_65 = arith.constant dense<0.000000e+00> : vector<16xf32>
      %149 = vector.multi_reduction <add>, %148, %cst_65 [1] : vector<16x16xf32> to vector<16xf32>
      %150 = vector.shape_cast %149 : vector<16xf32> to vector<16x1xf32>
      %151 = tpu.reciprocal %150 {approx = true} : vector<16x1xf32> -> vector<16x1xf32>
      %152 = vector.broadcast %151 : vector<16x1xf32> to vector<16x16xf32>
      %153 = arith.mulf %148, %152 : vector<16x16xf32>
      %154 = arith.truncf %153 : vector<16x16xf32> to vector<16x16xbf16>
      %cst_66 = arith.constant dense<0.000000e+00> : vector<16x32xf32>
      %155 = tpu.matmul %154, %141, %cst_66 {dimension_numbers = #tpu.dot_dimension_numbers<[1], [0], [0], [1], [0, 0, 1, 1], [], []>} : vector<16x16xbf16>, vector<16x32xbf16>, vector<16x32xf32> -> vector<16x32xf32>
      %156 = arith.truncf %155 : vector<16x32xf32> to vector<16x32xbf16>
      %c0_67 = arith.constant 0 : index
      %c96 = arith.constant 96 : index
      %157 = vector.load %arg24[%c0_67, %c96] : memref<32x128xbf16, #tpu.memory_space<vmem>>, vector<16x32xbf16>
      tpu.vector_store %arg24[%c0_67, %c96], %156 {strides = array<i32>} : memref<32x128xbf16, #tpu.memory_space<vmem>>, vector<16x32xbf16>,
      %c1 = arith.constant 1 : index
      %c0_68 = arith.constant 0 : index
      %c0_69 = arith.constant 0 : index
      %158 = vector.load %arg3[%c1, %c0_68, %c0_69] : memref<2x16x16xbf16, #tpu.memory_space<vmem>>, vector<1x16x16xbf16>
      %159 = vector.shape_cast %158 : vector<1x16x16xbf16> to vector<16x16xbf16>
      %160 = arith.extf %159 : vector<16x16xbf16> to vector<16x16xf32>
      %161 = vector.extract_strided_slice %62 {offsets = [16, 0], sizes = [16, 32], strides = [1, 1]} : vector<32x128xbf16> to vector<16x32xbf16>
      %162 = vector.extract_strided_slice %70 {offsets = [16, 0], sizes = [16, 32], strides = [1, 1]} : vector<32x128xbf16> to vector<16x32xbf16>
      %163 = vector.extract_strided_slice %78 {offsets = [16, 0], sizes = [16, 32], strides = [1, 1]} : vector<32x128xbf16> to vector<16x32xbf16>
      %cst_70 = arith.constant dense<0.000000e+00> : vector<16x16xf32>
      %164 = tpu.matmul %161, %162, %cst_70 {dimension_numbers = #tpu.dot_dimension_numbers<[1], [1], [0], [0], [0, 0, 1, 0], [], []>} : vector<16x32xbf16>, vector<16x32xbf16>, vector<16x16xf32> -> vector<16x16xf32>
      %165 = arith.addf %164, %160 : vector<16x16xf32>
      %cst_71 = arith.constant dense<0xFF800000> : vector<16xf32>
      %166 = vector.multi_reduction <maximumf>, %165, %cst_71 [1] : vector<16x16xf32> to vector<16xf32>
      %167 = vector.shape_cast %166 : vector<16xf32> to vector<16x1xf32>
      %168 = vector.broadcast %167 : vector<16x1xf32> to vector<16x16xf32>
      %169 = arith.subf %165, %168 : vector<16x16xf32>
      %170 = math.exp %169 : vector<16x16xf32>
      %cst_72 = arith.constant dense<0.000000e+00> : vector<16xf32>
      %171 = vector.multi_reduction <add>, %170, %cst_72 [1] : vector<16x16xf32> to vector<16xf32>
      %172 = vector.shape_cast %171 : vector<16xf32> to vector<16x1xf32>
      %173 = tpu.reciprocal %172 {approx = true} : vector<16x1xf32> -> vector<16x1xf32>
      %174 = vector.broadcast %173 : vector<16x1xf32> to vector<16x16xf32>
      %175 = arith.mulf %170, %174 : vector<16x16xf32>
      %176 = arith.truncf %175 : vector<16x16xf32> to vector<16x16xbf16>
      %cst_73 = arith.constant dense<0.000000e+00> : vector<16x32xf32>
      %177 = tpu.matmul %176, %163, %cst_73 {dimension_numbers = #tpu.dot_dimension_numbers<[1], [0], [0], [1], [0, 0, 1, 1], [], []>} : vector<16x16xbf16>, vector<16x32xbf16>, vector<16x32xf32> -> vector<16x32xf32>
      %178 = arith.truncf %177 : vector<16x32xf32> to vector<16x32xbf16>
      %c16 = arith.constant 16 : index
      %c0_74 = arith.constant 0 : index
      %179 = vector.load %arg24[%c16, %c0_74] : memref<32x128xbf16, #tpu.memory_space<vmem>>, vector<16x32xbf16>
      tpu.vector_store %arg24[%c16, %c0_74], %178 {strides = array<i32>} : memref<32x128xbf16, #tpu.memory_space<vmem>>, vector<16x32xbf16>,
      %180 = vector.extract_strided_slice %62 {offsets = [16, 32], sizes = [16, 32], strides = [1, 1]} : vector<32x128xbf16> to vector<16x32xbf16>
      %181 = vector.extract_strided_slice %70 {offsets = [16, 32], sizes = [16, 32], strides = [1, 1]} : vector<32x128xbf16> to vector<16x32xbf16>
      %182 = vector.extract_strided_slice %78 {offsets = [16, 32], sizes = [16, 32], strides = [1, 1]} : vector<32x128xbf16> to vector<16x32xbf16>
      %cst_75 = arith.constant dense<0.000000e+00> : vector<16x16xf32>
      %183 = tpu.matmul %180, %181, %cst_75 {dimension_numbers = #tpu.dot_dimension_numbers<[1], [1], [0], [0], [0, 0, 1, 0], [], []>} : vector<16x32xbf16>, vector<16x32xbf16>, vector<16x16xf32> -> vector<16x16xf32>
      %184 = arith.addf %183, %160 : vector<16x16xf32>
      %cst_76 = arith.constant dense<0xFF800000> : vector<16xf32>
      %185 = vector.multi_reduction <maximumf>, %184, %cst_76 [1] : vector<16x16xf32> to vector<16xf32>
      %186 = vector.shape_cast %185 : vector<16xf32> to vector<16x1xf32>
      %187 = vector.broadcast %186 : vector<16x1xf32> to vector<16x16xf32>
      %188 = arith.subf %184, %187 : vector<16x16xf32>
      %189 = math.exp %188 : vector<16x16xf32>
      %cst_77 = arith.constant dense<0.000000e+00> : vector<16xf32>
      %190 = vector.multi_reduction <add>, %189, %cst_77 [1] : vector<16x16xf32> to vector<16xf32>
      %191 = vector.shape_cast %190 : vector<16xf32> to vector<16x1xf32>
      %192 = tpu.reciprocal %191 {approx = true} : vector<16x1xf32> -> vector<16x1xf32>
      %193 = vector.broadcast %192 : vector<16x1xf32> to vector<16x16xf32>
      %194 = arith.mulf %189, %193 : vector<16x16xf32>
      %195 = arith.truncf %194 : vector<16x16xf32> to vector<16x16xbf16>
      %cst_78 = arith.constant dense<0.000000e+00> : vector<16x32xf32>
      %196 = tpu.matmul %195, %182, %cst_78 {dimension_numbers = #tpu.dot_dimension_numbers<[1], [0], [0], [1], [0, 0, 1, 1], [], []>} : vector<16x16xbf16>, vector<16x32xbf16>, vector<16x32xf32> -> vector<16x32xf32>
      %197 = arith.truncf %196 : vector<16x32xf32> to vector<16x32xbf16>
      %c16_79 = arith.constant 16 : index
      %c32_80 = arith.constant 32 : index
      %198 = vector.load %arg24[%c16_79, %c32_80] : memref<32x128xbf16, #tpu.memory_space<vmem>>, vector<16x32xbf16>
      tpu.vector_store %arg24[%c16_79, %c32_80], %197 {strides = array<i32>} : memref<32x128xbf16, #tpu.memory_space<vmem>>, vector<16x32xbf16>,
      %199 = vector.extract_strided_slice %62 {offsets = [16, 64], sizes = [16, 32], strides = [1, 1]} : vector<32x128xbf16> to vector<16x32xbf16>
      %200 = vector.extract_strided_slice %70 {offsets = [16, 64], sizes = [16, 32], strides = [1, 1]} : vector<32x128xbf16> to vector<16x32xbf16>
      %201 = vector.extract_strided_slice %78 {offsets = [16, 64], sizes = [16, 32], strides = [1, 1]} : vector<32x128xbf16> to vector<16x32xbf16>
      %cst_81 = arith.constant dense<0.000000e+00> : vector<16x16xf32>
      %202 = tpu.matmul %199, %200, %cst_81 {dimension_numbers = #tpu.dot_dimension_numbers<[1], [1], [0], [0], [0, 0, 1, 0], [], []>} : vector<16x32xbf16>, vector<16x32xbf16>, vector<16x16xf32> -> vector<16x16xf32>
      %203 = arith.addf %202, %160 : vector<16x16xf32>
      %cst_82 = arith.constant dense<0xFF800000> : vector<16xf32>
      %204 = vector.multi_reduction <maximumf>, %203, %cst_82 [1] : vector<16x16xf32> to vector<16xf32>
      %205 = vector.shape_cast %204 : vector<16xf32> to vector<16x1xf32>
      %206 = vector.broadcast %205 : vector<16x1xf32> to vector<16x16xf32>
      %207 = arith.subf %203, %206 : vector<16x16xf32>
      %208 = math.exp %207 : vector<16x16xf32>
      %cst_83 = arith.constant dense<0.000000e+00> : vector<16xf32>
      %209 = vector.multi_reduction <add>, %208, %cst_83 [1] : vector<16x16xf32> to vector<16xf32>
      %210 = vector.shape_cast %209 : vector<16xf32> to vector<16x1xf32>
      %211 = tpu.reciprocal %210 {approx = true} : vector<16x1xf32> -> vector<16x1xf32>
      %212 = vector.broadcast %211 : vector<16x1xf32> to vector<16x16xf32>
      %213 = arith.mulf %208, %212 : vector<16x16xf32>
      %214 = arith.truncf %213 : vector<16x16xf32> to vector<16x16xbf16>
      %cst_84 = arith.constant dense<0.000000e+00> : vector<16x32xf32>
      %215 = tpu.matmul %214, %201, %cst_84 {dimension_numbers = #tpu.dot_dimension_numbers<[1], [0], [0], [1], [0, 0, 1, 1], [], []>} : vector<16x16xbf16>, vector<16x32xbf16>, vector<16x32xf32> -> vector<16x32xf32>
      %216 = arith.truncf %215 : vector<16x32xf32> to vector<16x32xbf16>
      %c16_85 = arith.constant 16 : index
      %c64_86 = arith.constant 64 : index
      %217 = vector.load %arg24[%c16_85, %c64_86] : memref<32x128xbf16, #tpu.memory_space<vmem>>, vector<16x32xbf16>
      tpu.vector_store %arg24[%c16_85, %c64_86], %216 {strides = array<i32>} : memref<32x128xbf16, #tpu.memory_space<vmem>>, vector<16x32xbf16>,
      %218 = vector.extract_strided_slice %62 {offsets = [16, 96], sizes = [16, 32], strides = [1, 1]} : vector<32x128xbf16> to vector<16x32xbf16>
      %219 = vector.extract_strided_slice %70 {offsets = [16, 96], sizes = [16, 32], strides = [1, 1]} : vector<32x128xbf16> to vector<16x32xbf16>
      %220 = vector.extract_strided_slice %78 {offsets = [16, 96], sizes = [16, 32], strides = [1, 1]} : vector<32x128xbf16> to vector<16x32xbf16>
      %cst_87 = arith.constant dense<0.000000e+00> : vector<16x16xf32>
      %221 = tpu.matmul %218, %219, %cst_87 {dimension_numbers = #tpu.dot_dimension_numbers<[1], [1], [0], [0], [0, 0, 1, 0], [], []>} : vector<16x32xbf16>, vector<16x32xbf16>, vector<16x16xf32> -> vector<16x16xf32>
      %222 = arith.addf %221, %160 : vector<16x16xf32>
      %cst_88 = arith.constant dense<0xFF800000> : vector<16xf32>
      %223 = vector.multi_reduction <maximumf>, %222, %cst_88 [1] : vector<16x16xf32> to vector<16xf32>
      %224 = vector.shape_cast %223 : vector<16xf32> to vector<16x1xf32>
      %225 = vector.broadcast %224 : vector<16x1xf32> to vector<16x16xf32>
      %226 = arith.subf %222, %225 : vector<16x16xf32>
      %227 = math.exp %226 : vector<16x16xf32>
      %cst_89 = arith.constant dense<0.000000e+00> : vector<16xf32>
      %228 = vector.multi_reduction <add>, %227, %cst_89 [1] : vector<16x16xf32> to vector<16xf32>
      %229 = vector.shape_cast %228 : vector<16xf32> to vector<16x1xf32>
      %230 = tpu.reciprocal %229 {approx = true} : vector<16x1xf32> -> vector<16x1xf32>
      %231 = vector.broadcast %230 : vector<16x1xf32> to vector<16x16xf32>
      %232 = arith.mulf %227, %231 : vector<16x16xf32>
      %233 = arith.truncf %232 : vector<16x16xf32> to vector<16x16xbf16>
      %cst_90 = arith.constant dense<0.000000e+00> : vector<16x32xf32>
      %234 = tpu.matmul %233, %220, %cst_90 {dimension_numbers = #tpu.dot_dimension_numbers<[1], [0], [0], [1], [0, 0, 1, 1], [], []>} : vector<16x16xbf16>, vector<16x32xbf16>, vector<16x32xf32> -> vector<16x32xf32>
      %235 = arith.truncf %234 : vector<16x32xf32> to vector<16x32xbf16>
      %c16_91 = arith.constant 16 : index
      %c96_92 = arith.constant 96 : index
      %236 = vector.load %arg24[%c16_91, %c96_92] : memref<32x128xbf16, #tpu.memory_space<vmem>>, vector<16x32xbf16>
      tpu.vector_store %arg24[%c16_91, %c96_92], %235 {strides = array<i32>} : memref<32x128xbf16, #tpu.memory_space<vmem>>, vector<16x32xbf16>,
      %c0_93 = arith.constant 0 : index
      %c0_94 = arith.constant 0 : index
      %237 = vector.load %arg24[%c0_93, %c0_94] : memref<32x128xbf16, #tpu.memory_space<vmem>>, vector<32x128xbf16>
      %c0_95 = arith.constant 0 : index
      %c0_96 = arith.constant 0 : index
      %238 = vector.load %arg12[%c0_95, %c0_96] : memref<128x128xbf16, #tpu.memory_space<vmem>>, vector<128x128xbf16>
      %cst_97 = arith.constant dense<0.000000e+00> : vector<32x128xf32>
      %239 = tpu.matmul %237, %238, %cst_97 {dimension_numbers = #tpu.dot_dimension_numbers<[1], [0], [0], [1], [0, 0, 1, 1], [], []>} : vector<32x128xbf16>, vector<128x128xbf16>, vector<32x128xf32> -> vector<32x128xf32>
      %c0_98 = arith.constant 0 : index
      %c0_99 = arith.constant 0 : index
      %240 = vector.load %arg13[%c0_98, %c0_99] : memref<1x128xf32, #tpu.memory_space<vmem>>, vector<1x128xf32>
      %241 = vector.shape_cast %240 : vector<1x128xf32> to vector<128xf32>
      %242 = vector.shape_cast %241 : vector<128xf32> to vector<1x128xf32>
      %243 = vector.broadcast %242 : vector<1x128xf32> to vector<32x128xf32>
      %244 = arith.addf %239, %243 : vector<32x128xf32>
      %245 = arith.addf %244, %23 : vector<32x128xf32>
      %c0_100 = arith.constant 0 : index
      %c0_101 = arith.constant 0 : index
      %246 = vector.load %arg21[%c0_100, %c0_101] : memref<32x128xf32, #tpu.memory_space<vmem>>, vector<32x128xf32>
      tpu.vector_store %arg21[%c0_100, %c0_101], %245 {strides = array<i32>} : memref<32x128xf32, #tpu.memory_space<vmem>>, vector<32x128xf32>,
      %c0_102 = arith.constant 0 : index
      %c0_103 = arith.constant 0 : index
      %247 = vector.load %arg14[%c0_102, %c0_103] : memref<1x128xf32, #tpu.memory_space<vmem>>, vector<1x128xf32>
      %248 = vector.shape_cast %247 : vector<1x128xf32> to vector<128xf32>
      %c0_104 = arith.constant 0 : index
      %c0_105 = arith.constant 0 : index
      %249 = vector.load %arg15[%c0_104, %c0_105] : memref<1x128xf32, #tpu.memory_space<vmem>>, vector<1x128xf32>
      %250 = vector.shape_cast %249 : vector<1x128xf32> to vector<128xf32>
      %cst_106 = arith.constant dense<0.000000e+00> : vector<32xf32>
      %251 = vector.multi_reduction <add>, %245, %cst_106 [1] : vector<32x128xf32> to vector<32xf32>
      %252 = vector.shape_cast %251 : vector<32xf32> to vector<32x1xf32>
      %cst_107 = arith.constant 1.280000e+02 : f32
      %253 = vector.broadcast %cst_107 : f32 to vector<32x1xf32>
      %254 = arith.divf %252, %253 : vector<32x1xf32>
      %255 = vector.broadcast %254 : vector<32x1xf32> to vector<32x128xf32>
      %256 = arith.subf %245, %255 : vector<32x128xf32>
      %257 = arith.mulf %256, %256 : vector<32x128xf32>
      %cst_108 = arith.constant dense<0.000000e+00> : vector<32xf32>
      %258 = vector.multi_reduction <add>, %257, %cst_108 [1] : vector<32x128xf32> to vector<32xf32>
      %259 = vector.shape_cast %258 : vector<32xf32> to vector<32x1xf32>
      %cst_109 = arith.constant 1.280000e+02 : f32
      %260 = vector.broadcast %cst_109 : f32 to vector<32x1xf32>
      %261 = arith.divf %259, %260 : vector<32x1xf32>
      %262 = vector.broadcast %254 : vector<32x1xf32> to vector<32x128xf32>
      %263 = arith.subf %245, %262 : vector<32x128xf32>
      %cst_110 = arith.constant 9.99999997E-7 : f32
      %264 = vector.broadcast %cst_110 : f32 to vector<32x1xf32>
      %265 = arith.addf %261, %264 : vector<32x1xf32>
      %266 = math.rsqrt %265 : vector<32x1xf32>
      %267 = vector.broadcast %266 : vector<32x1xf32> to vector<32x128xf32>
      %268 = arith.mulf %263, %267 : vector<32x128xf32>
      %269 = vector.shape_cast %248 : vector<128xf32> to vector<1x128xf32>
      %270 = vector.broadcast %269 : vector<1x128xf32> to vector<32x128xf32>
      %271 = arith.mulf %268, %270 : vector<32x128xf32>
      %272 = vector.shape_cast %250 : vector<128xf32> to vector<1x128xf32>
      %273 = vector.broadcast %272 : vector<1x128xf32> to vector<32x128xf32>
      %274 = arith.addf %271, %273 : vector<32x128xf32>
      %275 = arith.truncf %274 : vector<32x128xf32> to vector<32x128xbf16>
      %c0_111 = arith.constant 0 : index
      %c0_112 = arith.constant 0 : index
      %276 = vector.load %arg22[%c0_111, %c0_112] : memref<32x128xbf16, #tpu.memory_space<vmem>>, vector<32x128xbf16>
      tpu.vector_store %arg22[%c0_111, %c0_112], %275 {strides = array<i32>} : memref<32x128xbf16, #tpu.memory_space<vmem>>, vector<32x128xbf16>,
      %cst_113 = arith.constant 0.000000e+00 : f32
      %277 = vector.broadcast %cst_113 : f32 to vector<32x128xf32>
      %c0_114 = arith.constant 0 : index
      %c0_115 = arith.constant 0 : index
      %278 = vector.load %arg23[%c0_114, %c0_115] : memref<32x128xf32, #tpu.memory_space<vmem>>, vector<32x128xf32>
      tpu.vector_store %arg23[%c0_114, %c0_115], %277 {strides = array<i32>} : memref<32x128xf32, #tpu.memory_space<vmem>>, vector<32x128xf32>,
    } else {
    }
    %c0 = arith.constant 0 : index
    %c0_1 = arith.constant 0 : index
    %3 = vector.load %arg22[%c0, %c0_1] : memref<32x128xbf16, #tpu.memory_space<vmem>>, vector<32x128xbf16>
    %c0_2 = arith.constant 0 : index
    %c0_3 = arith.constant 0 : index
    %4 = vector.load %arg16[%c0_2, %c0_3] : memref<128x256xbf16, #tpu.memory_space<vmem>>, vector<128x256xbf16>
    %cst = arith.constant dense<0.000000e+00> : vector<32x256xf32>
    %5 = tpu.matmul %3, %4, %cst {dimension_numbers = #tpu.dot_dimension_numbers<[1], [0], [0], [1], [0, 0, 1, 1], [], []>} : vector<32x128xbf16>, vector<128x256xbf16>, vector<32x256xf32> -> vector<32x256xf32>
    %c0_4 = arith.constant 0 : index
    %c0_5 = arith.constant 0 : index
    %6 = vector.load %arg17[%c0_4, %c0_5] : memref<1x256xf32, #tpu.memory_space<vmem>>, vector<1x256xf32>
    %7 = vector.shape_cast %6 : vector<1x256xf32> to vector<256xf32>
    %8 = vector.shape_cast %7 : vector<256xf32> to vector<1x256xf32>
    %9 = vector.broadcast %8 : vector<1x256xf32> to vector<32x256xf32>
    %10 = arith.addf %5, %9 : vector<32x256xf32>
    %cst_6 = arith.constant 0.000000e+00 : f32
    %11 = vector.broadcast %cst_6 : f32 to vector<32x256xf32>
    %12 = arith.maximumf %10, %11 : vector<32x256xf32>
    %c0_7 = arith.constant 0 : index
    %c0_8 = arith.constant 0 : index
    %13 = vector.load %arg23[%c0_7, %c0_8] : memref<32x128xf32, #tpu.memory_space<vmem>>, vector<32x128xf32>
    %14 = arith.truncf %12 : vector<32x256xf32> to vector<32x256xbf16>
    %c0_9 = arith.constant 0 : index
    %c0_10 = arith.constant 0 : index
    %15 = vector.load %arg18[%c0_9, %c0_10] : memref<256x128xbf16, #tpu.memory_space<vmem>>, vector<256x128xbf16>
    %cst_11 = arith.constant dense<0.000000e+00> : vector<32x128xf32>
    %16 = tpu.matmul %14, %15, %cst_11 {dimension_numbers = #tpu.dot_dimension_numbers<[1], [0], [0], [1], [0, 0, 1, 1], [], []>} : vector<32x256xbf16>, vector<256x128xbf16>, vector<32x128xf32> -> vector<32x128xf32>
    %17 = arith.addf %13, %16 : vector<32x128xf32>
    %c0_12 = arith.constant 0 : index
    %c0_13 = arith.constant 0 : index
    %18 = vector.load %arg23[%c0_12, %c0_13] : memref<32x128xf32, #tpu.memory_space<vmem>>, vector<32x128xf32>
    tpu.vector_store %arg23[%c0_12, %c0_13], %17 {strides = array<i32>} : memref<32x128xf32, #tpu.memory_space<vmem>>, vector<32x128xf32>,
    %c0_i32_14 = arith.constant 0 : i32
    %19 = arith.cmpi eq, %arg1, %c0_i32_14 : i32
    %20 = arith.extui %19 : i1 to i32
    %c0_i32_15 = arith.constant 0 : i32
    %21 = arith.cmpi ne, %20, %c0_i32_15 : i32
    scf.if %21 {
      %c0_16 = arith.constant 0 : index
      %c0_17 = arith.constant 0 : index
      %22 = vector.load %arg23[%c0_16, %c0_17] : memref<32x128xf32, #tpu.memory_space<vmem>>, vector<32x128xf32>
      %c0_18 = arith.constant 0 : index
      %c0_19 = arith.constant 0 : index
      %23 = vector.load %arg19[%c0_18, %c0_19] : memref<1x128xf32, #tpu.memory_space<vmem>>, vector<1x128xf32>
      %24 = vector.shape_cast %23 : vector<1x128xf32> to vector<128xf32>
      %25 = vector.shape_cast %24 : vector<128xf32> to vector<1x128xf32>
      %26 = vector.broadcast %25 : vector<1x128xf32> to vector<32x128xf32>
      %27 = arith.addf %22, %26 : vector<32x128xf32>
      %c0_20 = arith.constant 0 : index
      %c0_21 = arith.constant 0 : index
      %28 = vector.load %arg21[%c0_20, %c0_21] : memref<32x128xf32, #tpu.memory_space<vmem>>, vector<32x128xf32>
      %29 = arith.addf %27, %28 : vector<32x128xf32>
      %30 = vector.shape_cast %29 : vector<32x128xf32> to vector<2x16x128xf32>
      %c0_22 = arith.constant 0 : index
      %c0_23 = arith.constant 0 : index
      %c0_24 = arith.constant 0 : index
      %31 = vector.load %arg20[%c0_22, %c0_23, %c0_24] : memref<2x16x128xf32, #tpu.memory_space<vmem>>, vector<2x16x128xf32>
      tpu.vector_store %arg20[%c0_22, %c0_23, %c0_24], %30 {strides = array<i32>} : memref<2x16x128xf32, #tpu.memory_space<vmem>>, vector<2x16x128xf32>,
    } else {
    }
    return
  }
  func.func @transform_0(%arg0: i32, %arg1: i32) -> (i32, i32, i32) {
    %c0_i32 = arith.constant 0 : i32
    %c0_i32_0 = arith.constant 0 : i32
    %c0_i32_1 = arith.constant 0 : i32
    return %arg0, %c0_i32, %c0_i32_0 : i32, i32, i32
  }
  func.func @transform_1(%arg0: i32, %arg1: i32) -> (i32, i32, i32) {
    %c0_i32 = arith.constant 0 : i32
    %c0_i32_0 = arith.constant 0 : i32
    %c0_i32_1 = arith.constant 0 : i32
    return %arg0, %c0_i32, %c0_i32_0 : i32, i32, i32
  }
  func.func @transform_2(%arg0: i32, %arg1: i32) -> (i32, i32) {
    %c0_i32 = arith.constant 0 : i32
    %c0_i32_0 = arith.constant 0 : i32
    %c0_i32_1 = arith.constant 0 : i32
    return %c0_i32, %c0_i32_0 : i32, i32
  }
  func.func @transform_3(%arg0: i32, %arg1: i32) -> (i32, i32) {
    %c0_i32 = arith.constant 0 : i32
    %c0_i32_0 = arith.constant 0 : i32
    %c0_i32_1 = arith.constant 0 : i32
    return %c0_i32, %c0_i32_0 : i32, i32
  }
  func.func @transform_4(%arg0: i32, %arg1: i32) -> (i32, i32) {
    %c0_i32 = arith.constant 0 : i32
    %c0_i32_0 = arith.constant 0 : i32
    %c0_i32_1 = arith.constant 0 : i32
    return %c0_i32, %c0_i32_0 : i32, i32
  }
  func.func @transform_5(%arg0: i32, %arg1: i32) -> (i32, i32) {
    %c0_i32 = arith.constant 0 : i32
    %c0_i32_0 = arith.constant 0 : i32
    %c0_i32_1 = arith.constant 0 : i32
    return %c0_i32, %c0_i32_0 : i32, i32
  }
  func.func @transform_6(%arg0: i32, %arg1: i32) -> (i32, i32) {
    %c0_i32 = arith.constant 0 : i32
    %c0_i32_0 = arith.constant 0 : i32
    %c0_i32_1 = arith.constant 0 : i32
    return %c0_i32, %c0_i32_0 : i32, i32
  }
  func.func @transform_7(%arg0: i32, %arg1: i32) -> (i32, i32) {
    %c0_i32 = arith.constant 0 : i32
    %c0_i32_0 = arith.constant 0 : i32
    %c0_i32_1 = arith.constant 0 : i32
    return %c0_i32, %c0_i32_0 : i32, i32
  }
  func.func @transform_8(%arg0: i32, %arg1: i32) -> (i32, i32) {
    %c0_i32 = arith.constant 0 : i32
    %c0_i32_0 = arith.constant 0 : i32
    %c0_i32_1 = arith.constant 0 : i32
    return %c0_i32, %c0_i32_0 : i32, i32
  }
  func.func @transform_9(%arg0: i32, %arg1: i32) -> (i32, i32) {
    %c0_i32 = arith.constant 0 : i32
    %c0_i32_0 = arith.constant 0 : i32
    %c0_i32_1 = arith.constant 0 : i32
    return %c0_i32, %c0_i32_0 : i32, i32
  }
  func.func @transform_10(%arg0: i32, %arg1: i32) -> (i32, i32) {
    %c0_i32 = arith.constant 0 : i32
    %c0_i32_0 = arith.constant 0 : i32
    %c0_i32_1 = arith.constant 0 : i32
    return %c0_i32, %c0_i32_0 : i32, i32
  }
  func.func @transform_11(%arg0: i32, %arg1: i32) -> (i32, i32) {
    %c0_i32 = arith.constant 0 : i32
    %c0_i32_0 = arith.constant 0 : i32
    %c0_i32_1 = arith.constant 0 : i32
    return %c0_i32, %c0_i32_0 : i32, i32
  }
  func.func @transform_12(%arg0: i32, %arg1: i32) -> (i32, i32) {
    %c0_i32 = arith.constant 0 : i32
    %c0_i32_0 = arith.constant 0 : i32
    %c0_i32_1 = arith.constant 0 : i32
    return %c0_i32, %c0_i32_0 : i32, i32
  }
  func.func @transform_13(%arg0: i32, %arg1: i32) -> (i32, i32) {
    %c0_i32 = arith.constant 0 : i32
    %c0_i32_0 = arith.constant 0 : i32
    %c0_i32_1 = arith.constant 0 : i32
    return %c0_i32, %c0_i32_0 : i32, i32
  }
  func.func @transform_14(%arg0: i32, %arg1: i32) -> (i32, i32) {
    %c0_i32 = arith.constant 0 : i32
    %c0_i32_0 = arith.constant 0 : i32
    return %c0_i32, %arg1 : i32, i32
  }
  func.func @transform_15(%arg0: i32, %arg1: i32) -> (i32, i32) {
    %c0_i32 = arith.constant 0 : i32
    %c0_i32_0 = arith.constant 0 : i32
    return %c0_i32, %arg1 : i32, i32
  }
  func.func @transform_16(%arg0: i32, %arg1: i32) -> (i32, i32) {
    %c0_i32 = arith.constant 0 : i32
    %c0_i32_0 = arith.constant 0 : i32
    return %arg1, %c0_i32 : i32, i32
  }
  func.func @transform_17(%arg0: i32, %arg1: i32) -> (i32, i32) {
    %c0_i32 = arith.constant 0 : i32
    %c0_i32_0 = arith.constant 0 : i32
    %c0_i32_1 = arith.constant 0 : i32
    return %c0_i32, %c0_i32_0 : i32, i32
  }
  func.func @transform_18(%arg0: i32, %arg1: i32) -> (i32, i32, i32) {
    %c0_i32 = arith.constant 0 : i32
    %c0_i32_0 = arith.constant 0 : i32
    %c0_i32_1 = arith.constant 0 : i32
    return %arg0, %c0_i32, %c0_i32_0 : i32, i32, i32
  }
}

</mosaic_0001>

<bundles_post_ra>
// kernel: tpu_custom_call.1
= control target key start
LH: loop header
LB: loop body
LE: loop exit
PB: predicated region body
PF: predicated region fallthrough
CT: control target
= control target key end

     0   :  { %s3601_s0 = inlined_call_operand.hbm [shape: f32[2,16,128], index: 0, kind: input, shape index: {}]   ;;  %s3602_s1 = inlined_call_operand.hbm [shape: bf16[2,16,16], index: 1, kind: input, shape index: {}]   ;;  %s3603_s2 = inlined_call_operand.vmem [shape: f32[1,128], index: 2, kind: input, shape index: {}]   ;;  %s3604_s3 = inlined_call_operand.vmem [shape: f32[1,128], index: 3, kind: input, shape index: {}]   ;;  %s3605_s4 = inlined_call_operand.hbm [shape: bf16[128,128], index: 4, kind: input, shape index: {}]   ;;  %s3606_s5 = inlined_call_operand.vmem [shape: f32[1,128], index: 5, kind: input, shape index: {}]   ;;  %s3607_s6 = inlined_call_operand.hbm [shape: bf16[128,128], index: 6, kind: input, shape index: {}]   ;;  %s3608_s7 = inlined_call_operand.vmem [shape: f32[1,128], index: 7, kind: input, shape index: {}]   ;;  %s3609_s8 = inlined_call_operand.hbm [shape: bf16[128,128], index: 8, kind: input, shape index: {}]   ;;  %s3610_s9 = inlined_call_operand.vmem [shape: f32[1,128], index: 9, kind: input, shape index: {}]   ;;  %s3611_s10 = inlined_call_operand.hbm [shape: bf16[128,128], index: 10, kind: input, shape index: {}]   ;;  %s3612_s11 = inlined_call_operand.vmem [shape: f32[1,128], index: 11, kind: input, shape index: {}]   ;;  %s3613_s12 = inlined_call_operand.vmem [shape: f32[1,128], index: 12, kind: input, shape index: {}]   ;;  %s3614_s13 = inlined_call_operand.vmem [shape: f32[1,128], index: 13, kind: input, shape index: {}]   ;;  %s3615_s14 = inlined_call_operand.hbm [shape: bf16[128,256], index: 14, kind: input, shape index: {}]   ;;  %s3616_s15 = inlined_call_operand.vmem [shape: f32[1,256], index: 15, kind: input, shape index: {}]   ;;  %s3617_s16 = inlined_call_operand.hbm [shape: bf16[256,128], index: 16, kind: input, shape index: {}]   ;;  %s3618_s17 = inlined_call_operand.vmem [shape: f32[1,128], index: 17, kind: input, shape index: {}]   ;;  %s3619_s18 = inlined_call_operand.hbm [shape: f32[2,16,128], index: 18, kind: output, shape index: {}]  }
   0x1   :  { %3623 = sst [smem:[#allocation27_spill]] %s3601_s0 }
   0x2   :  { %3624 = sst [smem:[#allocation28_spill]] %s3602_s1 }
   0x3   :  { %3625 = sst [smem:[#allocation29_spill]] %s3603_s2 }
   0x4   :  { %3626 = sst [smem:[#allocation30_spill]] %s3618_s17 }
   0x5   :  { %3627 = sst [smem:[#allocation31_spill]] %s3619_s18 }
   0x6   :  { %23 = vsyncpa [#allocation7], 0 }
   0x7   :  { %24 = vsyncpa [#allocation10], 0 }
   0x8   :  { %25 = vsyncpa [#allocation13], 0 }
   0x9   :  { %26 = vsyncpa [#allocation16], 0 }
   0xa   :  { %27 = vsyncpa [#allocation19], 0 }
   0xb   :  { %28 = vsyncpa [#allocation8], 0  ;;  %s3007_s27 = smov [#allocation9]   ;;  %s3628_s0 = sld [smem:[#allocation28_spill]] }
   0xc   :  { %s46_s28 = sshll.u32 %s3007_s27, 4  ;;  %s47_s28 = int_to_ptr.vmem [resolvable:$true] %s46_s28 }
  0x11   :  { %s2797_s19 = scalar_lea.hbm %s3628_s0, 256 }
  0x12   :  { %p2798_p0 = scmp.ne.s32.totalorder %s3628_s0, %s2797_s19  ;;  %p2801_p1 = scmp.lt.u32.totalorder %s2797_s19, %s3628_s0 }
  0x14   :  { %p2803_p2 = pnand %p2801_p1, %p2798_p0 }
  0x16   :  { %2806 = shalt.err (!%p2803_p2)
}
  0x17   :  { %s2807_s2 = scalar_lea.vmem %s47_s28, 256  ;;  %p2812_p4 = scmp.lt.s32.totalorder %s47_s28, %s47_s28 }
  0x18   :  { %p2808_p3 = scmp.ne.s32.totalorder %s47_s28, %s2807_s2  ;;  %p2813_p5 = scmp.lt.s32.totalorder %s2807_s2, %s2807_s2 }
  0x1a   :  { %p2814_p6 = por %p2813_p5, %p2812_p4 }
  0x1c   :  { %p2815_p7 = pnand %p2814_p6, %p2808_p3 }
  0x1e   :  { %2818 = shalt.err (!%p2815_p7)
}
  0x1f   :  { %s3008_s23 = smov 64   ;;  %s3009_s24 = smov 4  }
  0x20   :  { %52 = dma.hbm_to_vmem [thread:$0]  %s3628_s0, 256, %s47_s28, [#allocation10], %s3008_s23, %s3008_s23, %s3009_s24  }
  0x21   :  { %s3010_s27 = smov [#allocation12]   ;;  %s3011_s30 = smov [#allocation15]  }
  0x22   :  { %s76_s29 = sshll.u32 %s3010_s27, 4  ;;  %s104_s19 = sshll.u32 %s3011_s30, 4  ;;  %s77_s29 = int_to_ptr.vmem [resolvable:$true] %s76_s29  ;;  %s105_s19 = int_to_ptr.vmem [resolvable:$true] %s104_s19 }
  0x23   :  { %s2819_s21 = scalar_lea.hbm %s3607_s6, 1024 }
  0x24   :  { %p2820_p8 = scmp.ne.s32.totalorder %s3607_s6, %s2819_s21  ;;  %p2823_p9 = scmp.lt.u32.totalorder %s2819_s21, %s3607_s6 }
  0x26   :  { %p2825_p10 = pnand %p2823_p9, %p2820_p8 }
  0x28   :  { %2828 = shalt.err (!%p2825_p10)
}
  0x29   :  { %s2829_s28 = scalar_lea.vmem %s77_s29, 1024  ;;  %p2834_p12 = scmp.lt.s32.totalorder %s77_s29, %s77_s29 }
  0x2a   :  { %p2830_p11 = scmp.ne.s32.totalorder %s77_s29, %s2829_s28  ;;  %p2835_p13 = scmp.lt.s32.totalorder %s2829_s28, %s2829_s28 }
  0x2c   :  { %p2836_p0 = por %p2835_p13, %p2834_p12 }
  0x2e   :  { %p2837_p1 = pnand %p2836_p0, %p2830_p11 }
  0x30   :  { %2840 = shalt.err (!%p2837_p1)
}
  0x31   :  { %82 = dma.hbm_to_vmem [thread:$0]  %s3607_s6, 1024, %s77_s29, [#allocation13], %s3008_s23, %s3008_s23, %s3009_s24  }
  0x32   :  { %s2841_s18 = scalar_lea.hbm %s3611_s10, 1024 }
  0x33   :  { %p2842_p2 = scmp.ne.s32.totalorder %s3611_s10, %s2841_s18  ;;  %p2845_p3 = scmp.lt.u32.totalorder %s2841_s18, %s3611_s10 }
  0x35   :  { %p2847_p4 = pnand %p2845_p3, %p2842_p2 }
  0x37   :  { %2850 = shalt.err (!%p2847_p4)
}
  0x38   :  { %s2851_s21 = scalar_lea.vmem %s105_s19, 1024  ;;  %p2856_p6 = scmp.lt.s32.totalorder %s105_s19, %s105_s19 }
  0x39   :  { %p2852_p5 = scmp.ne.s32.totalorder %s105_s19, %s2851_s21  ;;  %p2857_p7 = scmp.lt.s32.totalorder %s2851_s21, %s2851_s21 }
  0x3b   :  { %p2858_p8 = por %p2857_p7, %p2856_p6 }
  0x3d   :  { %p2859_p9 = pnand %p2858_p8, %p2852_p5 }
  0x3f   :  { %2862 = shalt.err (!%p2859_p9)
}
  0x40   :  { %110 = dma.hbm_to_vmem [thread:$0]  %s3611_s10, 1024, %s105_s19, [#allocation16], %s3008_s23, %s3008_s23, %s3009_s24  }
  0x41   :  { %s3012_s22 = smov [#allocation6]   ;;  %s3629_s25 = sld [smem:[#allocation27_spill]] }
  0x42   :  { %s34_s2 = sshll.u32 %s3012_s22, 4  ;;  %s35_s2 = int_to_ptr.vmem [resolvable:$true] %s34_s2 }
  0x47   :  { %s2863_s26 = scalar_lea.hbm %s3629_s25, 512 }
  0x48   :  { %p2864_p10 = scmp.ne.s32.totalorder %s3629_s25, %s2863_s26  ;;  %p2867_p11 = scmp.lt.u32.totalorder %s2863_s26, %s3629_s25 }
  0x4a   :  { %p2869_p12 = pnand %p2867_p11, %p2864_p10 }
  0x4c   :  { %2872 = shalt.err (!%p2869_p12)
}
  0x4d   :  { %s2873_s1 = scalar_lea.vmem %s35_s2, 512  ;;  %p2878_p0 = scmp.lt.s32.totalorder %s35_s2, %s35_s2 }
  0x4e   :  { %p2874_p13 = scmp.ne.s32.totalorder %s35_s2, %s2873_s1  ;;  %p2879_p1 = scmp.lt.s32.totalorder %s2873_s1, %s2873_s1 }
  0x50   :  { %p2880_p2 = por %p2879_p1, %p2878_p0 }
  0x52   :  { %p2881_p3 = pnand %p2880_p2, %p2874_p13 }
  0x54   :  { %2884 = shalt.err (!%p2881_p3)
}
  0x55   :  { %s3013_s10 = smov 128   ;;  %s3014_s19 = smov 8  }
  0x56   :  { %40 = dma.hbm_to_vmem [thread:$0]  %s3629_s25, 512, %s35_s2, [#allocation7], %s3013_s10, %s3013_s10, %s3014_s19  }
  0x57   :  { %s3015_s6 = smov [#allocation11]   ;;  %s3016_s22 = smov [#allocation14]  }
  0x58   :  { %s62_s29 = sshll.u32 %s3015_s6, 4  ;;  %s90_s28 = sshll.u32 %s3016_s22, 4  ;;  %s63_s29 = int_to_ptr.vmem [resolvable:$true] %s62_s29  ;;  %s3180_s28 = int_to_ptr.vmem [resolvable:$true] %s90_s28 }
  0x59   :  { %s2885_s17 = scalar_lea.hbm %s3605_s4, 1024 }
  0x5a   :  { %p2886_p4 = scmp.ne.s32.totalorder %s3605_s4, %s2885_s17  ;;  %p2889_p5 = scmp.lt.u32.totalorder %s2885_s17, %s3605_s4 }
  0x5c   :  { %p2891_p6 = pnand %p2889_p5, %p2886_p4 }
  0x5e   :  { %2894 = shalt.err (!%p2891_p6)
}
  0x5f   :  { %s2895_s2 = scalar_lea.vmem %s63_s29, 1024  ;;  %p2900_p8 = scmp.lt.s32.totalorder %s63_s29, %s63_s29 }
  0x60   :  { %p2896_p7 = scmp.ne.s32.totalorder %s63_s29, %s2895_s2  ;;  %p2901_p9 = scmp.lt.s32.totalorder %s2895_s2, %s2895_s2 }
  0x62   :  { %p2902_p10 = por %p2901_p9, %p2900_p8 }
  0x64   :  { %p2903_p11 = pnand %p2902_p10, %p2896_p7 }
  0x66   :  { %2906 = shalt.err (!%p2903_p11)
}
  0x67   :  { %68 = dma.hbm_to_vmem [thread:$0]  %s3605_s4, 1024, %s63_s29, [#allocation10], %s3008_s23, %s3008_s23, %s3009_s24  }
  0x68   :  { %s2907_s22 = scalar_lea.hbm %s3609_s8, 1024 }
  0x69   :  { %p2908_p12 = scmp.ne.s32.totalorder %s3609_s8, %s2907_s22  ;;  %p2911_p13 = scmp.lt.u32.totalorder %s2907_s22, %s3609_s8 }
  0x6b   :  { %p2913_p0 = pnand %p2911_p13, %p2908_p12 }
  0x6d   :  { %2916 = shalt.err (!%p2913_p0)
}
  0x6e   :  { %s2917_s27 = scalar_lea.vmem %s3180_s28, 1024  ;;  %p2922_p2 = scmp.lt.s32.totalorder %s3180_s28, %s3180_s28 }
  0x6f   :  { %p2918_p1 = scmp.ne.s32.totalorder %s3180_s28, %s2917_s27  ;;  %p2923_p3 = scmp.lt.s32.totalorder %s2917_s27, %s2917_s27 }
  0x71   :  { %p2924_p4 = por %p2923_p3, %p2922_p2 }
  0x73   :  { %p2925_p5 = pnand %p2924_p4, %p2918_p1 }
  0x75   :  { %2928 = shalt.err (!%p2925_p5)
}
  0x76   :  { %96 = dma.hbm_to_vmem [thread:$0]  %s3609_s8, 1024, %s3180_s28, [#allocation13], %s3008_s23, %s3008_s23, %s3009_s24  }
  0x77   :  { %s3017_s30 = smov [#allocation17]   ;;  %s3018_s2 = smov [#allocation18]  }
  0x78   :  { %s122_s1 = sshll.u32 %s3017_s30, 4  ;;  %s136_s25 = sshll.u32 %s3018_s2, 4  ;;  %s123_s1 = int_to_ptr.vmem [resolvable:$true] %s122_s1  ;;  %s3217_s25 = int_to_ptr.vmem [resolvable:$true] %s136_s25 }
  0x79   :  { %s2929_s6 = scalar_lea.hbm %s3615_s14, 2048 }
  0x7a   :  { %p2930_p6 = scmp.ne.s32.totalorder %s3615_s14, %s2929_s6  ;;  %p2933_p7 = scmp.lt.u32.totalorder %s2929_s6, %s3615_s14 }
  0x7c   :  { %p2935_p8 = pnand %p2933_p7, %p2930_p6 }
  0x7e   :  { %2938 = shalt.err (!%p2935_p8)
}
  0x7f   :  { %s2939_s8 = scalar_lea.vmem %s123_s1, 2048  ;;  %p2944_p10 = scmp.lt.s32.totalorder %s123_s1, %s123_s1 }
  0x80   :  { %p2940_p9 = scmp.ne.s32.totalorder %s123_s1, %s2939_s8  ;;  %p2945_p11 = scmp.lt.s32.totalorder %s2939_s8, %s2939_s8 }
  0x82   :  { %p2946_p12 = por %p2945_p11, %p2944_p10 }
  0x84   :  { %p2947_p13 = pnand %p2946_p12, %p2940_p9 }
  0x86   :  { %2950 = shalt.err (!%p2947_p13)
}
  0x87   :  { %128 = dma.hbm_to_vmem [thread:$0]  %s3615_s14, 2048, %s123_s1, [#allocation16], %s3013_s10, %s3013_s10, %s3014_s19  }
  0x88   :  { %s2951_s29 = scalar_lea.hbm %s3617_s16, 2048 }
  0x89   :  { %p2952_p0 = scmp.ne.s32.totalorder %s3617_s16, %s2951_s29  ;;  %p2955_p1 = scmp.lt.u32.totalorder %s2951_s29, %s3617_s16 }
  0x8b   :  { %p2957_p2 = pnand %p2955_p1, %p2952_p0 }
  0x8d   :  { %2960 = shalt.err (!%p2957_p2)
}
  0x8e   :  { %s2961_s6 = scalar_lea.vmem %s3217_s25, 2048  ;;  %p2966_p4 = scmp.lt.s32.totalorder %s3217_s25, %s3217_s25 }
  0x8f   :  { %p2962_p3 = scmp.ne.s32.totalorder %s3217_s25, %s2961_s6  ;;  %p2967_p5 = scmp.lt.s32.totalorder %s2961_s6, %s2961_s6 }
  0x91   :  { %p2968_p6 = por %p2967_p5, %p2966_p4 }
  0x93   :  { %p2969_p7 = pnand %p2968_p6, %p2962_p3 }
  0x95   :  { %2972 = shalt.err (!%p2969_p7)
}
  0x96   :  { %142 = dma.hbm_to_vmem [thread:$0]  %s3617_s16, 2048, %s3217_s25, [#allocation19], %s3008_s23, %s3008_s23, %s3009_s24  }
  0x97   :  { %2995 = dma.done.wait [#allocation7], 512  }
  0x98   :  { %2996 = vsyncadd [#allocation7], 4294966784 }
  0x99   :  { %2997 = dma.done.wait [#allocation10], 1280  }
  0x9a   :  { %2998 = vsyncadd [#allocation10], 4294966016 }
  0x9b   :  { %2999 = dma.done.wait [#allocation13], 2048  }
  0x9c   :  { %3000 = vsyncadd [#allocation13], 4294965248 }
  0x9d   :  { %3001 = dma.done.wait [#allocation16], 3072  }
  0x9e   :  { %3002 = vsyncadd [#allocation16], 4294964224 }
  0x9f   :  { %3003 = dma.done.wait [#allocation19], 2048  }
  0xa0   :  { %3004 = vsyncadd [#allocation19], 4294965248  ;;  %v174_v0 = vld [vmem:[#allocation6] sm:$0xff]  ;;  %v176_v1 = vld [vmem:[#allocation6 + $0x10] sm:$0xff]  ;;  %s3630_s25 = sld [smem:[#allocation29_spill]]  ;;  %vm3020_vm0 = vmmov 0  }
  0xa1   :  { %v175_v2 = vld [vmem:[#allocation6 + $0x8] sm:$0xff]  ;;  %180 = vadd.xlane.f32.xlu0 %v174_v0  ;;  %184 = vadd.xlane.f32.xlu1 %v176_v1  ;;  %v177_v3 = vld [vmem:[#allocation6 + $0x18] sm:$0xff]  ;;  %v2641_v4 = vld [vmem:[#allocation11] sm:$0xff]   ;;  %vm621_vm1 = vcmask 261120   ;;  %vm669_vm2 = vcmask 130048   ;;  %s3022_s28 = smov 32  }
  0xa2   :  { %v2642_v5 = vld [vmem:[#allocation12] sm:$0xff]   ;;  %2447 = vmatprep.subr.bf16.mxu0 %v2641_v4  ;;  %v2643_v22 = vld [vmem:[#allocation11 + $0x8] sm:$0xff]   ;;  %v2645_v24 = vld [vmem:[#allocation11 + $0x10] sm:$0xff]   ;;  %vm868_vm3 = vcmask 523520   ;;  %vm996_vm4 = vcmask 785920   ;;  %vm1124_vm5 = vcmask 1048320  }
  0xa3   :  { %2467 = vmatprep.subr.bf16.mxu1 %v2642_v5  ;;  %2448 = vmatpush3.bf16.msra.mxu0 %v2641_v4  ;;  %v2644_v23 = vld [vmem:[#allocation12 + $0x8] sm:$0xff]   ;;  %v2646_v25 = vld [vmem:[#allocation12 + $0x10] sm:$0xff]   ;;  %v2647_v26 = vld [vmem:[#allocation11 + $0x18] sm:$0xff]   ;;  %s3631_s2 = sld [smem:[#allocation30_spill]]  ;;  %s3024_s20 = smov [#allocation20]  }
  0xa4   :  { %2468 = vmatpush3.bf16.msra.mxu1 %v2642_v5  ;;  %2449 = vmatprep.subr.bf16.mxu0 %v2643_v22  ;;  %v2648_v27 = vld [vmem:[#allocation12 + $0x18] sm:$0xff]   ;;  %v2649_v28 = vld [vmem:[#allocation11 + $0x20] sm:$0xff]   ;;  %v2651_v30 = vld [vmem:[#allocation11 + $0x28] sm:$0xff]   ;;  %s2234_s21 = sshll.u32 %s3024_s20, 4  ;;  %s2235_s21 = int_to_ptr.vmem [resolvable:$true] %s2234_s21 }
  0xa5   :  { %182 = vadd.xlane.f32.xlu0 %v175_v2  ;;  %186 = vadd.xlane.f32.xlu1 %v177_v3  ;;  %v2650_v29 = vld [vmem:[#allocation12 + $0x20] sm:$0xff]   ;;  %v2652_v31 = vld [vmem:[#allocation12 + $0x28] sm:$0xff]   ;;  %v2653_v32 = vld [vmem:[#allocation11 + $0x30] sm:$0xff]   ;;  %s2973_s6 = scalar_lea.vmem %s2235_s21, 512  ;;  %p2978_p9 = scmp.lt.s32.totalorder %s2235_s21, %s2235_s21 }
  0xa6   :  { %2469 = vmatprep.subr.bf16.mxu1 %v2644_v23  ;;  %v2654_v33 = vld [vmem:[#allocation12 + $0x30] sm:$0xff]   ;;  %v2655_v34 = vld [vmem:[#allocation11 + $0x38] sm:$0xff]   ;;  %v2657_v36 = vld [vmem:[#allocation14] sm:$0xff]   ;;  %p2974_p8 = scmp.ne.s32.totalorder %s2235_s21, %s2973_s6  ;;  %p2979_p10 = scmp.lt.s32.totalorder %s2973_s6, %s2973_s6 }
  0xa7   :  { %2450 = vmatpush3.bf16.msra.mxu0 %v2643_v22  ;;  %v2656_v35 = vld [vmem:[#allocation12 + $0x38] sm:$0xff]   ;;  %v2250_v51 = vld [vmem:[%s3630_s25] ss:$0 sm:$0xff]  ;;  %v2658_v5 = vld [vmem:[#allocation14 + $0x8] sm:$0xff]  }
  0xa8   :  { %2470 = vmatpush3.bf16.msra.mxu1 %v2644_v23  ;;  %2451 = vmatprep.subr.bf16.mxu0 %v2645_v24  ;;  %v2251_v56 = vld [vmem:[%s3604_s3] ss:$0 sm:$0xff]  ;;  %p2980_p11 = por %p2979_p10, %p2978_p9 }
  0xa9   :  { %2471 = vmatprep.subr.bf16.mxu1 %v2646_v25 }
  0xaa   :  { %p2981_p12 = pnand %p2980_p11, %p2974_p8 }
  0xab   :  { %2452 = vmatpush3.bf16.msra.mxu0 %v2645_v24 }
  0xac   :  { %2472 = vmatpush3.bf16.msra.mxu1 %v2646_v25  ;;  %2453 = vmatprep.subr.bf16.mxu0 %v2647_v26 }
  0xad   :  { %2473 = vmatprep.subr.bf16.mxu1 %v2648_v27 }
  0xaf   :  { %2454 = vmatpush3.bf16.msra.mxu0 %v2647_v26 }
  0xb0   :  { %2474 = vmatpush3.bf16.msra.mxu1 %v2648_v27  ;;  %2455 = vmatprep.subr.bf16.mxu0 %v2649_v28 }
  0xb1   :  { %2475 = vmatprep.subr.bf16.mxu1 %v2650_v29 }
  0xb3   :  { %2456 = vmatpush3.bf16.msra.mxu0 %v2649_v28 }
  0xb4   :  { %2476 = vmatpush3.bf16.msra.mxu1 %v2650_v29  ;;  %2457 = vmatprep.subr.bf16.mxu0 %v2651_v30 }
  0xb5   :  { %2477 = vmatprep.subr.bf16.mxu1 %v2652_v31 }
  0xb7   :  { %2458 = vmatpush3.bf16.msra.mxu0 %v2651_v30 }
  0xb8   :  { %2478 = vmatpush3.bf16.msra.mxu1 %v2652_v31  ;;  %2459 = vmatprep.subr.bf16.mxu0 %v2653_v32 }
  0xb9   :  { %2479 = vmatprep.subr.bf16.mxu1 %v2654_v33 }
  0xbb   :  { %2460 = vmatpush3.bf16.msra.mxu0 %v2653_v32 }
  0xbc   :  { %2480 = vmatpush3.bf16.msra.mxu1 %v2654_v33  ;;  %2461 = vmatprep.subr.bf16.mxu0 %v2655_v34 }
  0xbd   :  { %2481 = vmatprep.subr.bf16.mxu1 %v2656_v35 }
  0xbf   :  { %2462 = vmatpush3.bf16.msra.mxu0 %v2655_v34 }
  0xc0   :  { %2482 = vmatpush3.bf16.msra.mxu1 %v2656_v35  ;;  %2487 = vmatprep.subr.bf16.mxu0 %v2657_v36 }
 0x12e   :  { %v181_v6 = vpop.xlane.xlu0 %180  ;;  %v185_v7 = vpop.xlane.xlu1 %184 }
 0x12f   :  { %v189_v8 = vmul.f32 0.0078125, %v181_v6  ;;  %v191_v9 = vmul.f32 0.0078125, %v185_v7  ;;  %v2659_v6 = vld [vmem:[#allocation14 + $0x10] sm:$0xff]   ;;  %v2660_v7 = vld [vmem:[#allocation14 + $0x18] sm:$0xff]  }
 0x131   :  { %v3254_v10 = vsub.f32 %v174_v0, %v189_v8  ;;  %v3256_v11 = vsub.f32 %v176_v1, %v191_v9  ;;  %v2661_v8 = vld [vmem:[#allocation14 + $0x20] sm:$0xff]   ;;  %v2662_v9 = vld [vmem:[#allocation14 + $0x28] sm:$0xff]  }
 0x132   :  { %v183_v12 = vpop.xlane.xlu0 %182  ;;  %v187_v13 = vpop.xlane.xlu1 %186 }
 0x133   :  { %v190_v14 = vmul.f32 0.0078125, %v183_v12  ;;  %v197_v15 = vmul.f32 %v3254_v10, %v3254_v10  ;;  %v192_v16 = vmul.f32 0.0078125, %v187_v13  ;;  %v199_v19 = vmul.f32 %v3256_v11, %v3256_v11  ;;  %v2252_v13 = vld [vmem:[%s3606_s5] ss:$0 sm:$0xff] }
 0x134   :  { %v3019_v12 = vmov 0.0  }
 0x135   :  { %v3260_v17 = vsub.f32 %v175_v2, %v190_v14  ;;  %201 = vadd.xlane.f32.xlu0 %v197_v15  ;;  %v3262_v18 = vsub.f32 %v177_v3, %v192_v16  ;;  %2507 = vmatprep.subr.bf16.mxu1 %v3019_v12  ;;  %v2261_v16 = vld [vmem:[%s3608_s7] ss:$0 sm:$0xff] }
 0x137   :  { %v198_v20 = vmul.f32 %v3260_v17, %v3260_v17  ;;  %v200_v21 = vmul.f32 %v3262_v18, %v3262_v18 }
 0x139   :  { %205 = vadd.xlane.f32.xlu0 %v199_v19  ;;  %203 = vadd.xlane.f32.xlu1 %v198_v20 }
 0x13d   :  { %207 = vadd.xlane.f32.xlu1 %v200_v21 }
 0x1c2   :  { %v202_v37 = vpop.xlane.xlu0 %201 }
 0x1c3   :  { %v209_v38 = vmul.f32 0.0078125, %v202_v37 }
 0x1c5   :  { %v213_v39 = vadd.f32 1e-06, %v209_v38 }
 0x1c6   :  { %v204_v40 = vpop.xlane.xlu1 %203  ;;  %v206_v41 = vpop.xlane.xlu0 %205 }
 0x1c7   :  { %2713 = vrsqrt.f32 %v213_v39  ;;  %v210_v42 = vmul.f32 0.0078125, %v204_v40  ;;  %v211_v43 = vmul.f32 0.0078125, %v206_v41  ;;  %v2270_v41 = vld [vmem:[%s3610_s9] ss:$0 sm:$0xff]  ;;  %s3021_s9 = smov 96  }
 0x1c9   :  { %v214_v44 = vadd.f32 1e-06, %v210_v42  ;;  %v215_v45 = vadd.f32 1e-06, %v211_v43 }
 0x1ca   :  { %v208_v46 = vpop.xlane.xlu1 %207 }
 0x1cb   :  { %2715 = vrsqrt.f32 %v214_v44  ;;  %v212_v47 = vmul.f32 0.0078125, %v208_v46 }
 0x1cc   :  { %2717 = vrsqrt.f32 %v215_v45 }
 0x1cd   :  { %v216_v48 = vadd.f32 1e-06, %v212_v47 }
 0x1cf   :  { %2719 = vrsqrt.f32 %v216_v48 }
 0x1d1   :  { %v2714_v49 = vpop.eup %2713 }
 0x1d2   :  { %v221_v50 = vmul.f32 %v2714_v49, %v3254_v10  ;;  %v2663_v10 = vld [vmem:[#allocation14 + $0x30] sm:$0xff]  }
 0x1d4   :  { %v231_v55 = vmul.f32 %v2250_v51, %v221_v50 }
 0x1d5   :  { %v2716_v52 = vpop.eup %2715 }
 0x1d6   :  { %v2718_v53 = vpop.eup %2717  ;;  %v222_v54 = vmul.f32 %v2716_v52, %v3260_v17  ;;  %v241_v60 = vadd.f32 %v2251_v56, %v231_v55  ;;  %v2340_v52 = vld [vmem:[#allocation9] sm:$0xff]  }
 0x1d7   :  { %v223_v57 = vmul.f32 %v2718_v53, %v3256_v11  ;;  %v2664_v11 = vld [vmem:[#allocation14 + $0x38] sm:$0xff]   ;;  %v3323_v53 = vunpack.c.l.bf16 %v2340_v52  ;;  %v3327_v55 = vunpack.c.h.bf16 %v2340_v52 }
 0x1d8   :  { %v232_v58 = vmul.f32 %v2250_v51, %v222_v54 }
 0x1d9   :  { %v2720_v59 = vpop.eup %2719  ;;  %v233_v63 = vmul.f32 %v2250_v51, %v223_v57 }
 0x1da   :  { %v242_v61 = vadd.f32 %v2251_v56, %v232_v58  ;;  %v224_v62 = vmul.f32 %v2720_v59, %v3262_v18 }
 0x1db   :  { %v243_v2 = vadd.f32 %v2251_v56, %v233_v63 }
 0x1dc   :  { %v245_v0 = vpack.c.bf16 %v242_v61, %v241_v60  ;;  %v234_v1 = vmul.f32 %v2250_v51, %v224_v62 }
 0x1de   :  { %2463 = vmatprep.mubr.bf16.mxu0 %v245_v0  ;;  %2483 = vmatprep.mubr.bf16.mxu1 %v245_v0  ;;  %v244_v3 = vadd.f32 %v2251_v56, %v234_v1 }
 0x1e0   :  { %v246_v4 = vpack.c.bf16 %v244_v3, %v243_v2 }
 0x1e2   :  { %2464 = vmatmul.mubr.bf16.vlgmr.msra.gmra.mrb[0].mxu0 %v246_v4  ;;  %2484 = vmatmul.mubr.bf16.vlgmr.msra.gmra.mrb[0].mxu1 %v246_v4 }
 0x1e3   :  { %2488 = vmatpush3.bf16.msra.mxu0 %v2657_v36  ;;  %2503 = vmatprep.mubr.bf16.mxu0 %v245_v0 }
 0x1e4   :  { %2489 = vmatprep.subr.bf16.mxu0 %v2658_v5  ;;  %2509 = vmatprep.mubr.msk.bf16.mxu1 %vm3020_vm0, %v3019_v12 }
 0x1e7   :  { %2490 = vmatpush3.bf16.msra.mxu0 %v2658_v5 }
 0x1e8   :  { %2491 = vmatprep.subr.bf16.mxu0 %v2659_v6 }
 0x1eb   :  { %2492 = vmatpush3.bf16.msra.mxu0 %v2659_v6 }
 0x1ec   :  { %2493 = vmatprep.subr.bf16.mxu0 %v2660_v7 }
 0x1ef   :  { %2494 = vmatpush3.bf16.msra.mxu0 %v2660_v7 }
 0x1f0   :  { %2495 = vmatprep.subr.bf16.mxu0 %v2661_v8 }
 0x1f3   :  { %2496 = vmatpush3.bf16.msra.mxu0 %v2661_v8 }
 0x1f4   :  { %2497 = vmatprep.subr.bf16.mxu0 %v2662_v9 }
 0x1f7   :  { %2498 = vmatpush3.bf16.msra.mxu0 %v2662_v9 }
 0x1f8   :  { %2499 = vmatprep.subr.bf16.mxu0 %v2663_v10 }
 0x1fb   :  { %2500 = vmatpush3.bf16.msra.mxu0 %v2663_v10 }
 0x1fc   :  { %2501 = vmatprep.subr.bf16.mxu0 %v2664_v11 }
 0x1ff   :  { %2502 = vmatpush3.bf16.msra.mxu0 %v2664_v11 }
 0x200   :  { %2555 = vmatprep.subr.bf16.mxu0 %v3019_v12 }
 0x202   :  { %2504 = vmatmul.mubr.bf16.vlgmr.msra.gmra.mrb[4].mxu0 %v246_v4 }
 0x203   :  { %2557 = vmatprep.mubr.msk.bf16.mxu0 %vm3020_vm0, %v3019_v12 }
 0x2b5   :  { %v2465_v14 = vpop.f32.mrb[0].mxu0  ;;  %v2485_v15 = vpop.f32.mrb[0].mxu1 }
 0x2b6   :  { %v361_v17 = vadd.f32 %v2465_v14, %v2252_v13  ;;  %v352_v18 = vpop.f32.mrb[1].mxu0  ;;  %v478_v19 = vpop.f32.mrb[1].mxu1  ;;  %v487_v23 = vadd.f32 %v2485_v15, %v2261_v16 }
 0x2b7   :  { %v353_v20 = vadd.f32 %v2252_v13, %v352_v18  ;;  %v2466_v21 = vpop.f32.mrb[2].mxu0  ;;  %v2486_v22 = vpop.f32.mrb[2].mxu1  ;;  %v479_v28 = vadd.f32 %v2261_v16, %v478_v19 }
 0x2b8   :  { %v364_v24 = vadd.f32 %v2466_v21, %v2252_v13  ;;  %v490_v25 = vadd.f32 %v2486_v22, %v2261_v16  ;;  %v355_v26 = vpop.f32.mrb[3].mxu0  ;;  %v481_v27 = vpop.f32.mrb[3].mxu1  ;;  %v369_v31 = vmul.f32 0.17677669, %v361_v17 }
 0x2b9   :  { %v356_v29 = vadd.f32 %v2252_v13, %v355_v26  ;;  %v482_v30 = vadd.f32 %v2261_v16, %v481_v27  ;;  %v367_v34 = vmul.f32 0.17677669, %v353_v20 }
 0x2ba   :  { %v370_v32 = vmul.f32 0.17677669, %v364_v24  ;;  %v3292_v33 = vpack.c.bf16 %v490_v25, %v487_v23 }
 0x2bb   :  { %v368_v35 = vmul.f32 0.17677669, %v356_v29  ;;  %v3294_v36 = vpack.c.bf16 %v482_v30, %v479_v28 }
 0x2bc   :  { %v3296_v37 = vpack.c.bf16 %v370_v32, %v369_v31  ;;  %v1135_v38 = vsel %vm621_vm1, %v3292_v33, 0 }
 0x2bd   :  { %v3300_v39 = vpack.c.bf16 %v368_v35, %v367_v34  ;;  %2556 = vmatpush3.bf16.xpose.msra.mxu0 %v1135_v38  ;;  %v626_v40 = vsel %vm621_vm1, %v3294_v36, 0 }
 0x2be   :  { %2508 = vmatpush3.bf16.xpose.msra.mxu1 %v626_v40  ;;  %2567 = vmatprep.subr.bf16.mxu0 %v3019_v12 }
 0x2bf   :  { %2513 = vmatprep.subr.bf16.mxu1 %v3019_v12 }
 0x2c4   :  { %2558 = vmatmul.mubr.msk.bf16.vlgmr.msra.gmra.mrb[8].mxu0 %vm621_vm1, %v3296_v37 }
 0x2c5   :  { %2510 = vmatmul.mubr.msk.bf16.vlgmr.msra.gmra.mrb[4].mxu1 %vm621_vm1, %v3300_v39  ;;  %2569 = vmatprep.mubr.msk.bf16.mxu0 %vm3020_vm0, %v3019_v12 }
 0x2c6   :  { %2515 = vmatprep.mubr.msk.bf16.mxu1 %vm3020_vm0, %v3019_v12 }
 0x2d5   :  { %v2505_v42 = vpop.f32.mrb[4].mxu0 }
 0x2d6   :  { %v609_v43 = vadd.f32 %v2505_v42, %v2270_v41  ;;  %v600_v44 = vpop.f32.mrb[5].mxu0 }
 0x2d7   :  { %v2506_v45 = vpop.f32.mrb[6].mxu0  ;;  %v601_v48 = vadd.f32 %v2270_v41, %v600_v44 }
 0x2d8   :  { %v612_v46 = vadd.f32 %v2506_v45, %v2270_v41  ;;  %v603_v47 = vpop.f32.mrb[7].mxu0 }
 0x2d9   :  { %v604_v49 = vadd.f32 %v2270_v41, %v603_v47 }
 0x2da   :  { %v3317_v50 = vpack.c.bf16 %v612_v46, %v609_v43 }
 0x2db   :  { %v3319_v51 = vpack.c.bf16 %v604_v49, %v601_v48 }
 0x2dd   :  { %2514 = vmatpush3.bf16.msra.mxu1 %v3319_v51 }
 0x2de   :  { %2519 = vmatprep.subr.bf16.mxu1 %v3019_v12 }
 0x397   :  { %v3325_v54 = vpop.f32.mrb[8].mxu0 }
 0x398   :  { %v662_v56 = vpop.f32.mrb[4].mxu1  ;;  %v2559_v57 = vpop.f32.mrb[9].mxu0 }
 0x399   :  { %v663_v58 = vadd.f32 %v3323_v53, %v662_v56  ;;  %v2511_v59 = vpop.f32.mrb[5].mxu1  ;;  %v3330_v60 = vpop.f32.mrb[10].mxu0 }
 0x39a   :  { %v665_v61 = vpop.f32.mrb[6].mxu1  ;;  %v2560_v62 = vpop.f32.mrb[11].mxu0 }
 0x39b   :  { %v666_v63 = vadd.f32 %v3327_v55, %v665_v61  ;;  %v2512_v0 = vpop.f32.mrb[7].mxu1  ;;  %v670_v1 = vsel %vm669_vm2, %v663_v58, -inf }
 0x39c   :  { %671 = vmax.xlane.f32.xlu0 %v670_v1 }
 0x39d   :  { %v673_v2 = vsel %vm669_vm2, %v666_v63, -inf }
 0x39e   :  { %674 = vmax.xlane.f32.xlu1 %v673_v2 }
 0x429   :  { %v672_v3 = vpop.xlane.xlu0 %671 }
 0x42a   :  { %v676_v4 = vsub.f32 %v663_v58, %v672_v3 }
 0x42b   :  { %v675_v5 = vpop.xlane.xlu1 %674 }
 0x42c   :  { %v678_v6 = vmul.f32 1.442695, %v676_v4  ;;  %v677_v7 = vsub.f32 %v666_v63, %v675_v5 }
 0x42e   :  { %2721 = vpow2.f32 %v678_v6  ;;  %v680_v8 = vmul.f32 1.442695, %v677_v7 }
 0x430   :  { %2723 = vpow2.f32 %v680_v8 }
 0x438   :  { %v2722_v9 = vpop.eup %2721 }
 0x439   :  { %v682_v10 = vsel %vm669_vm2, %v2722_v9, 0.0 }
 0x43a   :  { %v2724_v11 = vpop.eup %2723  ;;  %683 = vadd.xlane.f32.xlu0 %v682_v10 }
 0x43b   :  { %v685_v13 = vsel %vm669_vm2, %v2724_v11, 0.0 }
 0x43c   :  { %686 = vadd.xlane.f32.xlu1 %v685_v13 }
 0x44d   :  { %740 = vrot.lane.b32.xlu1 %v3300_v39, %s3021_s9 }
 0x450   :  { %743 = vrot.lane.b32.xlu0 %v3294_v36, %s3021_s9 }
 0x4c7   :  { %v684_v14 = vpop.xlane.xlu0 %683 }
 0x4c8   :  { %2725 = vrcp.f32 %v684_v14 }
 0x4c9   :  { %v687_v15 = vpop.xlane.xlu1 %686 }
 0x4ca   :  { %2727 = vrcp.f32 %v687_v15 }
 0x4cb   :  { %v744_v20 = vpop.permute.xlu0 %743 }
 0x4cc   :  { %v749_v22 = vsel %vm621_vm1, %v744_v20, 0 }
 0x4cd   :  { %v741_v23 = vpop.permute.xlu1 %740 }
 0x4d2   :  { %v2726_v16 = vpop.eup %2725 }
 0x4d3   :  { %v690_v18 = vmul.f32 %v2726_v16, %v2722_v9 }
 0x4d4   :  { %v2728_v17 = vpop.eup %2727 }
 0x4d5   :  { %v691_v19 = vmul.f32 %v2728_v17, %v2724_v11 }
 0x4d7   :  { %v692_v21 = vpack.c.bf16 %v691_v19, %v690_v18 }
 0x4d9   :  { %2516 = vmatmul.mubr.msk.bf16.vlgmr.msra.gmra.mrb[8].mxu1 %vm669_vm2, %v692_v21 }
 0x4da   :  { %2520 = vmatpush3.bf16.xpose.msra.mxu1 %v749_v22  ;;  %2521 = vmatprep.mubr.msk.bf16.mxu1 %vm3020_vm0, %v3019_v12 }
 0x4db   :  { %2525 = vmatprep.subr.bf16.mxu1 %v3019_v12 }
 0x4e1   :  { %2522 = vmatmul.mubr.msk.bf16.vlgmr.msra.gmra.mrb[12].mxu1 %vm621_vm1, %v741_v23 }
 0x4e2   :  { %2527 = vmatprep.mubr.msk.bf16.mxu1 %vm3020_vm0, %v3019_v12 }
 0x5ac   :  { %v730_v24 = vpop.f32.mrb[8].mxu1 }
 0x5ad   :  { %v2517_v25 = vpop.f32.mrb[9].mxu1 }
 0x5ae   :  { %v733_v26 = vpop.f32.mrb[10].mxu1 }
 0x5af   :  { %v737_v27 = vpack.c.bf16 %v733_v26, %v730_v24  ;;  %v2518_v28 = vpop.f32.mrb[11].mxu1 }
 0x5b1   :  { %738 = vst.msk [vmem:[#allocation5] sm:$0xff] %vm621_vm1, %v737_v27 }
 0x5b4   :  { %v785_v29 = vpop.f32.mrb[12].mxu1 }
 0x5b5   :  { %v786_v30 = vadd.f32 %v3323_v53, %v785_v29  ;;  %v2523_v31 = vpop.f32.mrb[13].mxu1 }
 0x5b6   :  { %v788_v32 = vpop.f32.mrb[14].mxu1 }
 0x5b7   :  { %v789_v34 = vadd.f32 %v3327_v55, %v788_v32  ;;  %v2524_v35 = vpop.f32.mrb[15].mxu1  ;;  %v792_v38 = vsel %vm669_vm2, %v786_v30, -inf }
 0x5b8   :  { %793 = vmax.xlane.f32.xlu1 %v792_v38 }
 0x5b9   :  { %v795_v40 = vsel %vm669_vm2, %v789_v34, -inf }
 0x5ba   :  { %796 = vmax.xlane.f32.xlu0 %v795_v40 }
 0x645   :  { %v794_v41 = vpop.xlane.xlu1 %793 }
 0x646   :  { %v798_v42 = vsub.f32 %v786_v30, %v794_v41 }
 0x647   :  { %v797_v43 = vpop.xlane.xlu0 %796 }
 0x648   :  { %v800_v44 = vmul.f32 1.442695, %v798_v42  ;;  %v799_v45 = vsub.f32 %v789_v34, %v797_v43 }
 0x64a   :  { %2729 = vpow2.f32 %v800_v44  ;;  %v802_v46 = vmul.f32 1.442695, %v799_v45 }
 0x64c   :  { %2731 = vpow2.f32 %v802_v46 }
 0x654   :  { %v2730_v47 = vpop.eup %2729 }
 0x655   :  { %v804_v48 = vsel %vm669_vm2, %v2730_v47, 0.0 }
 0x656   :  { %v2732_v49 = vpop.eup %2731  ;;  %805 = vadd.xlane.f32.xlu0 %v804_v48 }
 0x657   :  { %v807_v52 = vsel %vm669_vm2, %v2732_v49, 0.0 }
 0x658   :  { %808 = vadd.xlane.f32.xlu1 %v807_v52 }
 0x669   :  { %872 = vrot.lane.b32.xlu1 %v3294_v36, %s3008_s23 }
 0x66c   :  { %816 = vrot.lane.b32.xlu0 %v3319_v51, %s3021_s9 }
 0x66d   :  { %870 = vrot.lane.b32.xlu1 %v3300_v39, %s3008_s23 }
 0x6e3   :  { %v806_v56 = vpop.xlane.xlu0 %805 }
 0x6e4   :  { %2733 = vrcp.f32 %v806_v56 }
 0x6e5   :  { %v809_v57 = vpop.xlane.xlu1 %808 }
 0x6e6   :  { %2735 = vrcp.f32 %v809_v57 }
 0x6e7   :  { %v817_v58 = vpop.permute.xlu0 %816 }
 0x6e8   :  { %2526 = vmatpush3.bf16.msra.mxu1 %v817_v58 }
 0x6e9   :  { %2531 = vmatprep.subr.bf16.mxu1 %v3019_v12  ;;  %v873_v0 = vpop.permute.xlu1 %872 }
 0x6ea   :  { %v878_v2 = vsel %vm621_vm1, %v873_v0, 0 }
 0x6ed   :  { %v871_v3 = vpop.permute.xlu1 %870 }
 0x6ee   :  { %v2734_v59 = vpop.eup %2733 }
 0x6ef   :  { %v812_v62 = vmul.f32 %v2734_v59, %v2730_v47 }
 0x6f0   :  { %v2736_v61 = vpop.eup %2735 }
 0x6f1   :  { %v813_v63 = vmul.f32 %v2736_v61, %v2732_v49 }
 0x6f3   :  { %v814_v1 = vpack.c.bf16 %v813_v63, %v812_v62 }
 0x6f5   :  { %2528 = vmatmul.mubr.msk.bf16.vlgmr.msra.gmra.mrb[16].mxu1 %vm669_vm2, %v814_v1 }
 0x6f6   :  { %2532 = vmatpush3.bf16.xpose.msra.mxu1 %v878_v2  ;;  %2533 = vmatprep.mubr.msk.bf16.mxu1 %vm3020_vm0, %v3019_v12  ;;  %v2344_v2 = vld [vmem:[#allocation9 + $0x8] sm:$0xff]  }
 0x6f7   :  { %2537 = vmatprep.subr.bf16.mxu1 %v3019_v12 }
 0x6fd   :  { %2534 = vmatmul.mubr.msk.bf16.vlgmr.msra.gmra.mrb[20].mxu1 %vm621_vm1, %v871_v3 }
 0x6fe   :  { %2539 = vmatprep.mubr.msk.bf16.mxu1 %vm3020_vm0, %v3019_v12 }
 0x7c8   :  { %v3371_v4 = vpop.f32.mrb[16].mxu1 }
 0x7c9   :  { %v2529_v5 = vpop.f32.mrb[17].mxu1 }
 0x7ca   :  { %v3373_v6 = vpop.f32.mrb[18].mxu1  ;;  %v2345_v5 = vunpack.c.l.bf16 %v2344_v2 }
 0x7cb   :  { %v863_v7 = vpack.c.bf16 %v3373_v6, %v3371_v4  ;;  %v2530_v8 = vpop.f32.mrb[19].mxu1 }
 0x7d0   :  { %v914_v9 = vpop.f32.mrb[20].mxu1 }
 0x7d1   :  { %v915_v10 = vadd.f32 %v3323_v53, %v914_v9  ;;  %v2535_v11 = vpop.f32.mrb[21].mxu1 }
 0x7d2   :  { %v917_v13 = vpop.f32.mrb[22].mxu1 }
 0x7d3   :  { %v918_v14 = vadd.f32 %v3327_v55, %v917_v13  ;;  %v2536_v15 = vpop.f32.mrb[23].mxu1  ;;  %v921_v16 = vsel %vm669_vm2, %v915_v10, -inf }
 0x7d4   :  { %922 = vmax.xlane.f32.xlu1 %v921_v16  ;;  %v1172_v15 = vadd.f32 %v2345_v5, %v3325_v54  ;;  %v2346_v16 = vunpack.c.h.bf16 %v2344_v2 }
 0x7d5   :  { %v924_v17 = vsel %vm669_vm2, %v918_v14, -inf }
 0x7d6   :  { %925 = vmax.xlane.f32.xlu0 %v924_v17 }
 0x7e5   :  { %944 = vrot.lane.b32.xlu1 %v3319_v51, %s3008_s23 }
 0x7e9   :  { %998 = vrot.lane.b32.xlu1 %v3300_v39, %s3022_s28 }
 0x7ed   :  { %1251 = vrot.lane.b32.xlu1 %v3292_v33, %s3021_s9 }
 0x7f1   :  { %1248 = vrot.lane.b32.xlu1 %v3296_v37, %s3021_s9 }
 0x7f5   :  { %1377 = vrot.lane.b32.xlu1 %v3296_v37, %s3008_s23 }
 0x7f9   :  { %1504 = vrot.lane.b32.xlu1 %v3296_v37, %s3022_s28 }
 0x861   :  { %v923_v18 = vpop.xlane.xlu1 %922 }
 0x862   :  { %v927_v19 = vsub.f32 %v915_v10, %v923_v18 }
 0x863   :  { %v926_v20 = vpop.xlane.xlu0 %925 }
 0x864   :  { %v929_v21 = vmul.f32 1.442695, %v927_v19  ;;  %v928_v22 = vsub.f32 %v918_v14, %v926_v20 }
 0x865   :  { %v945_v23 = vpop.permute.xlu1 %944 }
 0x866   :  { %2737 = vpow2.f32 %v929_v21  ;;  %v931_v39 = vmul.f32 1.442695, %v928_v22  ;;  %2538 = vmatpush3.bf16.msra.mxu1 %v945_v23  ;;  %v1175_v23 = vadd.f32 %v2346_v16, %v3330_v60 }
 0x867   :  { %2543 = vmatprep.subr.bf16.mxu1 %v3019_v12 }
 0x868   :  { %2739 = vpow2.f32 %v931_v39  ;;  %v1178_v39 = vsel %vm669_vm2, %v1172_v15, -inf }
 0x869   :  { %v999_v24 = vpop.permute.xlu1 %998 }
 0x86d   :  { %v1252_v25 = vpop.permute.xlu1 %1251 }
 0x86e   :  { %v1257_v26 = vsel %vm621_vm1, %v1252_v25, 0  ;;  %v1181_v25 = vsel %vm669_vm2, %v1175_v23, -inf }
 0x86f   :  { %2568 = vmatpush3.bf16.xpose.msra.mxu0 %v1257_v26 }
 0x870   :  { %v2738_v27 = vpop.eup %2737  ;;  %2579 = vmatprep.subr.bf16.mxu0 %v3019_v12 }
 0x871   :  { %v933_v37 = vsel %vm669_vm2, %v2738_v27, 0.0  ;;  %v1249_v29 = vpop.permute.xlu1 %1248 }
 0x872   :  { %v2740_v28 = vpop.eup %2739  ;;  %934 = vadd.xlane.f32.xlu0 %v933_v37 }
 0x873   :  { %v936_v30 = vsel %vm669_vm2, %v2740_v28, 0.0 }
 0x875   :  { %v1378_v45 = vpop.permute.xlu1 %1377 }
 0x876   :  { %2570 = vmatmul.mubr.msk.bf16.vlgmr.msra.gmra.mrb[12].mxu0 %vm621_vm1, %v1249_v29  ;;  %937 = vadd.xlane.f32.xlu0 %v936_v30 }
 0x877   :  { %2581 = vmatprep.mubr.msk.bf16.mxu0 %vm3020_vm0, %v3019_v12 }
 0x879   :  { %v1505_v47 = vpop.permute.xlu1 %1504 }
 0x88c   :  { %1000 = vrot.lane.b32.xlu0 %v3294_v36, %s3022_s28 }
 0x890   :  { %1379 = vrot.lane.b32.xlu0 %v3292_v33, %s3008_s23 }
 0x894   :  { %1506 = vrot.lane.b32.xlu0 %v3292_v33, %s3022_s28 }
 0x8ff   :  { %v935_v31 = vpop.xlane.xlu0 %934 }
 0x900   :  { %2741 = vrcp.f32 %v935_v31 }
 0x903   :  { %v938_v32 = vpop.xlane.xlu0 %937 }
 0x904   :  { %2743 = vrcp.f32 %v938_v32 }
 0x907   :  { %v1001_v34 = vpop.permute.xlu0 %1000 }
 0x908   :  { %v1006_v33 = vsel %vm621_vm1, %v1001_v34, 0 }
 0x90a   :  { %v2742_v38 = vpop.eup %2741 }
 0x90b   :  { %v1380_v35 = vpop.permute.xlu0 %1379  ;;  %v941_v36 = vmul.f32 %v2742_v38, %v2738_v27 }
 0x90c   :  { %v1385_v40 = vsel %vm621_vm1, %v1380_v35, 0 }
 0x90d   :  { %2580 = vmatpush3.bf16.xpose.msra.mxu0 %v1385_v40 }
 0x90e   :  { %v2744_v41 = vpop.eup %2743  ;;  %2591 = vmatprep.subr.bf16.mxu0 %v3019_v12 }
 0x90f   :  { %v942_v42 = vmul.f32 %v2744_v41, %v2740_v28  ;;  %v1507_v43 = vpop.permute.xlu0 %1506 }
 0x910   :  { %v1512_v46 = vsel %vm621_vm1, %v1507_v43, 0 }
 0x911   :  { %v943_v44 = vpack.c.bf16 %v942_v42, %v941_v36 }
 0x913   :  { %2540 = vmatmul.mubr.msk.bf16.vlgmr.msra.gmra.mrb[24].mxu1 %vm669_vm2, %v943_v44 }
 0x914   :  { %2544 = vmatpush3.bf16.xpose.msra.mxu1 %v1006_v33  ;;  %2582 = vmatmul.mubr.msk.bf16.vlgmr.msra.gmra.mrb[16].mxu0 %vm621_vm1, %v1378_v45 }
 0x915   :  { %2592 = vmatpush3.bf16.xpose.msra.mxu0 %v1512_v46  ;;  %2545 = vmatprep.mubr.msk.bf16.mxu1 %vm3020_vm0, %v3019_v12 }
 0x916   :  { %2593 = vmatprep.mubr.msk.bf16.mxu0 %vm3020_vm0, %v3019_v12  ;;  %2549 = vmatprep.subr.bf16.mxu1 %v3019_v12 }
 0x91b   :  { %2546 = vmatmul.mubr.msk.bf16.vlgmr.msra.gmra.mrb[28].mxu1 %vm621_vm1, %v999_v24 }
 0x91c   :  { %2594 = vmatmul.mubr.msk.bf16.vlgmr.msra.gmra.mrb[20].mxu0 %vm621_vm1, %v1505_v47  ;;  %2551 = vmatprep.mubr.msk.bf16.mxu1 %vm3020_vm0, %v3019_v12 }
 0x949   :  { %v1293_v48 = vpop.f32.mrb[12].mxu0 }
 0x94a   :  { %v2571_v49 = vpop.f32.mrb[13].mxu0 }
 0x94b   :  { %v1296_v52 = vpop.f32.mrb[14].mxu0 }
 0x94c   :  { %v2572_v56 = vpop.f32.mrb[15].mxu0  ;;  %v1297_v22 = vadd.f32 %v2346_v16, %v1296_v52 }
 0x94e   :  { %v1303_v24 = vsel %vm669_vm2, %v1297_v22, -inf }
 0x9e6   :  { %v3422_v57 = vpop.f32.mrb[24].mxu1 }
 0x9e7   :  { %v2541_v58 = vpop.f32.mrb[25].mxu1  ;;  %v1421_v59 = vpop.f32.mrb[16].mxu0 }
 0x9e8   :  { %v3424_v61 = vpop.f32.mrb[26].mxu1  ;;  %v2583_v62 = vpop.f32.mrb[17].mxu0  ;;  %v1422_v37 = vadd.f32 %v2345_v5, %v1421_v59 }
 0x9e9   :  { %v991_v63 = vpack.c.bf16 %v3424_v61, %v3422_v57  ;;  %v2542_v0 = vpop.f32.mrb[27].mxu1  ;;  %v1424_v1 = vpop.f32.mrb[18].mxu0 }
 0x9ea   :  { %v2584_v3 = vpop.f32.mrb[19].mxu0  ;;  %v1425_v54 = vadd.f32 %v2346_v16, %v1424_v1  ;;  %v1428_v30 = vsel %vm669_vm2, %v1422_v37, -inf }
 0x9ec   :  { %v1431_v27 = vsel %vm669_vm2, %v1425_v54, -inf }
 0x9ee   :  { %v1042_v8 = vpop.f32.mrb[28].mxu1 }
 0x9ef   :  { %v3429_v9 = vadd.f32 %v3323_v53, %v1042_v8  ;;  %v2547_v10 = vpop.f32.mrb[29].mxu1  ;;  %v1548_v11 = vpop.f32.mrb[20].mxu0 }
 0x9f0   :  { %v1045_v13 = vpop.f32.mrb[30].mxu1  ;;  %v2595_v14 = vpop.f32.mrb[21].mxu0  ;;  %v1549_v29 = vadd.f32 %v2345_v5, %v1548_v11 }
 0x9f1   :  { %v1046_v17 = vadd.f32 %v3327_v55, %v1045_v13  ;;  %v2548_v18 = vpop.f32.mrb[31].mxu1  ;;  %v1551_v19 = vpop.f32.mrb[22].mxu0  ;;  %v1049_v20 = vsel %vm669_vm2, %v3429_v9, -inf  ;;  %v1294_v55 = vadd.f32 %v2345_v5, %v1293_v48 }
 0x9f2   :  { %v2596_v21 = vpop.f32.mrb[23].mxu0  ;;  %1050 = vmax.xlane.f32.xlu0 %v1049_v20  ;;  %v1552_v26 = vadd.f32 %v2346_v16, %v1551_v19  ;;  %v1555_v31 = vsel %vm669_vm2, %v1549_v29, -inf }
 0x9f3   :  { %v1052_v53 = vsel %vm669_vm2, %v1046_v17, -inf  ;;  %v1300_v28 = vsel %vm669_vm2, %v1294_v55, -inf }
 0x9f4   :  { %1053 = vmax.xlane.f32.xlu1 %v1052_v53  ;;  %v1558_v60 = vsel %vm669_vm2, %v1552_v26, -inf }
 0x9f6   :  { %1179 = vmax.xlane.f32.xlu0 %v1178_v39 }
 0x9f8   :  { %1304 = vmax.xlane.f32.xlu1 %v1303_v24 }
 0x9fa   :  { %1182 = vmax.xlane.f32.xlu0 %v1181_v25 }
 0x9fc   :  { %1432 = vmax.xlane.f32.xlu1 %v1431_v27 }
 0x9fe   :  { %1301 = vmax.xlane.f32.xlu0 %v1300_v28 }
 0xa00   :  { %1559 = vmax.xlane.f32.xlu1 %v1558_v60 }
 0xa02   :  { %1429 = vmax.xlane.f32.xlu0 %v1428_v30 }
 0xa06   :  { %1556 = vmax.xlane.f32.xlu0 %v1555_v31 }
 0xa7f   :  { %v1051_v32 = vpop.xlane.xlu0 %1050 }
 0xa80   :  { %v1055_v49 = vsub.f32 %v3429_v9, %v1051_v32 }
 0xa81   :  { %v1054_v34 = vpop.xlane.xlu1 %1053 }
 0xa82   :  { %v1056_v52 = vsub.f32 %v1046_v17, %v1054_v34  ;;  %v1057_v0 = vmul.f32 1.442695, %v1055_v49 }
 0xa83   :  { %v1180_v35 = vpop.xlane.xlu0 %1179 }
 0xa84   :  { %v1184_v38 = vsub.f32 %v1172_v15, %v1180_v35  ;;  %v1059_v2 = vmul.f32 1.442695, %v1056_v52 }
 0xa85   :  { %v1305_v40 = vpop.xlane.xlu1 %1304 }
 0xa86   :  { %v1186_v41 = vmul.f32 1.442695, %v1184_v38  ;;  %v1307_v36 = vsub.f32 %v1297_v22, %v1305_v40 }
 0xa87   :  { %v1183_v42 = vpop.xlane.xlu0 %1182 }
 0xa88   :  { %2745 = vpow2.f32 %v1186_v41  ;;  %v1185_v43 = vsub.f32 %v1175_v23, %v1183_v42  ;;  %v1310_v45 = vmul.f32 1.442695, %v1307_v36 }
 0xa89   :  { %v1433_v44 = vpop.xlane.xlu1 %1432 }
 0xa8a   :  { %v1188_v33 = vmul.f32 1.442695, %v1185_v43  ;;  %v1435_v46 = vsub.f32 %v1425_v54, %v1433_v44 }
 0xa8b   :  { %v1302_v47 = vpop.xlane.xlu0 %1301 }
 0xa8c   :  { %2747 = vpow2.f32 %v1188_v33  ;;  %v1306_v48 = vsub.f32 %v1294_v55, %v1302_v47  ;;  %v1438_v56 = vmul.f32 1.442695, %v1435_v46 }
 0xa8d   :  { %2749 = vpow2.f32 %v1310_v45  ;;  %v1560_v5 = vpop.xlane.xlu1 %1559 }
 0xa8e   :  { %v1308_v58 = vmul.f32 1.442695, %v1306_v48  ;;  %v1562_v13 = vsub.f32 %v1552_v26, %v1560_v5 }
 0xa8f   :  { %v1430_v59 = vpop.xlane.xlu0 %1429 }
 0xa90   :  { %2751 = vpow2.f32 %v1308_v58  ;;  %v1434_v62 = vsub.f32 %v1422_v37, %v1430_v59  ;;  %v1565_v18 = vmul.f32 1.442695, %v1562_v13  ;;  %v2666_v13 = vld [vmem:[#allocation15 + $0x8] sm:$0xff]  }
 0xa91   :  { %2753 = vpow2.f32 %v1438_v56 }
 0xa92   :  { %v3446_v1 = vpop.eup %2745  ;;  %v1436_v3 = vmul.f32 1.442695, %v1434_v62 }
 0xa93   :  { %v1557_v8 = vpop.xlane.xlu0 %1556  ;;  %v1190_v10 = vsel %vm669_vm2, %v3446_v1, 0.0 }
 0xa94   :  { %2755 = vpow2.f32 %v1436_v3  ;;  %v1561_v9 = vsub.f32 %v1549_v29, %v1557_v8  ;;  %1191 = vadd.xlane.f32.xlu0 %v1190_v10 }
 0xa95   :  { %2757 = vpow2.f32 %v1057_v0 }
 0xa96   :  { %v3450_v11 = vpop.eup %2747  ;;  %2759 = vpow2.f32 %v1059_v2  ;;  %v1563_v14 = vmul.f32 1.442695, %v1561_v9  ;;  %v2665_v9 = vld [vmem:[#allocation15] sm:$0xff]  }
 0xa97   :  { %v1193_v15 = vsel %vm669_vm2, %v3450_v11, 0.0  ;;  %v3454_v16 = vpop.eup %2749  ;;  %2603 = vmatprep.subr.bf16.mxu0 %v2665_v9 }
 0xa98   :  { %1194 = vadd.xlane.f32.xlu1 %v1193_v15  ;;  %2761 = vpow2.f32 %v1563_v14  ;;  %v1315_v20 = vsel %vm669_vm2, %v3454_v16, 0.0  ;;  %2604 = vmatpush3.bf16.msra.mxu0 %v2665_v9 }
 0xa99   :  { %2763 = vpow2.f32 %v1565_v18  ;;  %2605 = vmatprep.subr.bf16.mxu0 %v2666_v13 }
 0xa9a   :  { %v3456_v17 = vpop.eup %2751 }
 0xa9b   :  { %v1312_v19 = vsel %vm669_vm2, %v3456_v17, 0.0  ;;  %v3462_v21 = vpop.eup %2753 }
 0xa9c   :  { %1313 = vadd.xlane.f32.xlu0 %v1312_v19  ;;  %1316 = vadd.xlane.f32.xlu1 %v1315_v20  ;;  %v1443_v39 = vsel %vm669_vm2, %v3462_v21, 0.0  ;;  %v2668_v19 = vld [vmem:[#allocation15 + $0x18] sm:$0xff]  }
 0xa9d   :  { %2606 = vmatpush3.bf16.msra.mxu0 %v2666_v13 }
 0xa9e   :  { %v3464_v22 = vpop.eup %2755 }
 0xa9f   :  { %v2758_v53 = vpop.eup %2757  ;;  %v1440_v23 = vsel %vm669_vm2, %v3464_v22, 0.0 }
 0xaa0   :  { %v2760_v54 = vpop.eup %2759  ;;  %1441 = vadd.xlane.f32.xlu0 %v1440_v23  ;;  %1444 = vadd.xlane.f32.xlu1 %v1443_v39  ;;  %v1061_v24 = vsel %vm669_vm2, %v2758_v53, 0.0  ;;  %v2669_v23 = vld [vmem:[#allocation15 + $0x20] sm:$0xff]  }
 0xaa1   :  { %v1064_v55 = vsel %vm669_vm2, %v2760_v54, 0.0 }
 0xaa2   :  { %v3472_v25 = vpop.eup %2761 }
 0xaa3   :  { %v1567_v26 = vsel %vm669_vm2, %v3472_v25, 0.0  ;;  %v3476_v27 = vpop.eup %2763 }
 0xaa4   :  { %1062 = vadd.xlane.f32.xlu0 %v1061_v24  ;;  %1065 = vadd.xlane.f32.xlu1 %v1064_v55  ;;  %v1570_v37 = vsel %vm669_vm2, %v3476_v27, 0.0 }
 0xaa8   :  { %1568 = vadd.xlane.f32.xlu1 %v1567_v26 }
 0xaac   :  { %1571 = vadd.xlane.f32.xlu1 %v1570_v37 }
 0xaba   :  { %1072 = vrot.lane.b32.xlu0 %v3319_v51, %s3022_s28 }
 0xabd   :  { %1324 = vrot.lane.b32.xlu1 %v3317_v50, %s3021_s9 }
 0xabe   :  { %1451 = vrot.lane.b32.xlu0 %v3317_v50, %s3008_s23 }
 0xac1   :  { %1578 = vrot.lane.b32.xlu1 %v3317_v50, %s3022_s28 }
 0xac2   :  { %865 = vrot.lane.b32.xlu0 %v863_v7, %s3022_s28 }
 0xac5   :  { %993 = vrot.lane.b32.xlu1 %v991_v63, %s3008_s23 }
 0xb21   :  { %v1192_v51 = vpop.xlane.xlu0 %1191 }
 0xb25   :  { %v1195_v28 = vpop.xlane.xlu1 %1194 }
 0xb29   :  { %v1314_v60 = vpop.xlane.xlu0 %1313  ;;  %v1317_v29 = vpop.xlane.xlu1 %1316 }
 0xb2d   :  { %v1442_v30 = vpop.xlane.xlu0 %1441  ;;  %v1445_v31 = vpop.xlane.xlu1 %1444 }
 0xb31   :  { %v1063_v32 = vpop.xlane.xlu0 %1062  ;;  %v1066_v34 = vpop.xlane.xlu1 %1065 }
 0xb32   :  { %2765 = vrcp.f32 %v1063_v32 }
 0xb33   :  { %2767 = vrcp.f32 %v1066_v34 }
 0xb34   :  { %2769 = vrcp.f32 %v1195_v28 }
 0xb35   :  { %v1073_v35 = vpop.permute.xlu0 %1072  ;;  %v1569_v38 = vpop.xlane.xlu1 %1568  ;;  %2771 = vrcp.f32 %v1192_v51  ;;  %v2672_v51 = vld [vmem:[#allocation15 + $0x38] sm:$0xff]  }
 0xb36   :  { %2550 = vmatpush3.bf16.msra.mxu1 %v1073_v35  ;;  %2773 = vrcp.f32 %v1314_v60 }
 0xb37   :  { %2561 = vmatprep.subr.bf16.mxu1 %v3019_v12  ;;  %2775 = vrcp.f32 %v1317_v29 }
 0xb38   :  { %2777 = vrcp.f32 %v1442_v30 }
 0xb39   :  { %v1452_v4 = vpop.permute.xlu0 %1451  ;;  %v1572_v6 = vpop.xlane.xlu1 %1571  ;;  %2779 = vrcp.f32 %v1445_v31 }
 0xb3a   :  { %2781 = vrcp.f32 %v1572_v6 }
 0xb3b   :  { %2783 = vrcp.f32 %v1569_v38 }
 0xb3c   :  { %v2766_v7 = vpop.eup %2765 }
 0xb3d   :  { %v2768_v57 = vpop.eup %2767  ;;  %v1069_v61 = vmul.f32 %v2766_v7, %v2758_v53  ;;  %v866_v63 = vpop.permute.xlu0 %865 }
 0xb3e   :  { %v1325_v40 = vpop.permute.xlu1 %1324  ;;  %v1070_v41 = vmul.f32 %v2768_v57, %v2760_v54  ;;  %869 = vst.msk [vmem:[#allocation5] sm:$0xff] %vm868_vm3, %v866_v63  ;;  %v2770_v42 = vpop.eup %2769  ;;  %v2670_v54 = vld [vmem:[#allocation15 + $0x28] sm:$0xff]  }
 0xb3f   :  { %v2772_v44 = vpop.eup %2771  ;;  %v1199_v45 = vmul.f32 %v2770_v42, %v3450_v11 }
 0xb40   :  { %v1071_v36 = vpack.c.bf16 %v1070_v41, %v1069_v61  ;;  %v1198_v46 = vmul.f32 %v2772_v44, %v3446_v1  ;;  %v2774_v47 = vpop.eup %2773 }
 0xb41   :  { %v2776_v49 = vpop.eup %2775 }
 0xb42   :  { %v1579_v43 = vpop.permute.xlu1 %1578  ;;  %2552 = vmatmul.mubr.msk.bf16.vlgmr.msra.gmra.mrb[32].mxu1 %vm669_vm2, %v1071_v36  ;;  %v1200_v48 = vpack.c.bf16 %v1199_v45, %v1198_v46  ;;  %v1321_v52 = vmul.f32 %v2776_v49, %v3454_v16  ;;  %v2778_v56 = vpop.eup %2777 }
 0xb43   :  { %2562 = vmatpush3.bf16.msra.mxu1 %v3317_v50  ;;  %2563 = vmatprep.mubr.msk.bf16.mxu1 %vm3020_vm0, %v3019_v12  ;;  %v1320_v50 = vmul.f32 %v2774_v47, %v3456_v17  ;;  %v2780_v59 = vpop.eup %2779  ;;  %v1448_v62 = vmul.f32 %v2778_v56, %v3464_v22 }
 0xb44   :  { %2573 = vmatprep.subr.bf16.mxu1 %v3019_v12  ;;  %v1449_v0 = vmul.f32 %v2780_v59, %v3462_v21  ;;  %v2782_v2 = vpop.eup %2781 }
 0xb45   :  { %v1322_v58 = vpack.c.bf16 %v1321_v52, %v1320_v50  ;;  %v2784_v3 = vpop.eup %2783  ;;  %v1576_v5 = vmul.f32 %v2782_v2, %v3476_v27  ;;  %v2671_v27 = vld [vmem:[#allocation15 + $0x30] sm:$0xff]   ;;  %v2795_v50 = vld [vmem:[#allocation6 + $0x10] sm:$0xff] }
 0xb46   :  { %v994_v33 = vpop.permute.xlu1 %993  ;;  %v1450_v1 = vpack.c.bf16 %v1449_v0, %v1448_v62  ;;  %v1575_v8 = vmul.f32 %v2784_v3, %v3472_v25  ;;  %v2673_v62 = vld [vmem:[#allocation17] ss:$8 sps:$4 sm:$0xff]   ;;  %v2675_v0 = vld [vmem:[#allocation17 + $0x4] ss:$8 sps:$4 sm:$0xff]   ;;  %v2676_v2 = vld [vmem:[#allocation17 + $0x10] ss:$8 sps:$4 sm:$0xff]  }
 0xb47   :  { %997 = vst.msk [vmem:[#allocation5] sm:$0xff] %vm996_vm4, %v994_v33  ;;  %v2793_v33 = vld [vmem:[#allocation6] sm:$0xff] }
 0xb48   :  { %v1577_v10 = vpack.c.bf16 %v1576_v5, %v1575_v8 }
 0xb4a   :  { %2564 = vmatmul.mubr.msk.bf16.vlgmr.msra.gmra.mrb[36].mxu1 %vm669_vm2, %v1200_v48  ;;  %v2794_v48 = vld [vmem:[#allocation6 + $0x8] sm:$0xff] }
 0xb4b   :  { %2574 = vmatpush3.bf16.msra.mxu1 %v1325_v40  ;;  %2575 = vmatprep.mubr.msk.bf16.mxu1 %vm3020_vm0, %v3019_v12  ;;  %v2295_v40 = vld [vmem:[%s3612_s11] ss:$0 sm:$0xff] }
 0xb4c   :  { %2585 = vmatprep.subr.bf16.mxu1 %v3019_v12 }
 0xb52   :  { %2576 = vmatmul.mubr.msk.bf16.vlgmr.msra.gmra.mrb[40].mxu1 %vm669_vm2, %v1322_v58  ;;  %v2796_v58 = vld [vmem:[#allocation6 + $0x18] sm:$0xff] }
 0xb53   :  { %2586 = vmatpush3.bf16.msra.mxu1 %v1452_v4  ;;  %2587 = vmatprep.mubr.msk.bf16.mxu1 %vm3020_vm0, %v3019_v12 }
 0xb54   :  { %2597 = vmatprep.subr.bf16.mxu1 %v3019_v12 }
 0xb5a   :  { %2588 = vmatmul.mubr.msk.bf16.vlgmr.msra.gmra.mrb[44].mxu1 %vm669_vm2, %v1450_v1  ;;  %v2678_v1 = vld [vmem:[#allocation17 + $0x14] ss:$8 sps:$4 sm:$0xff]  }
 0xb5b   :  { %2598 = vmatpush3.bf16.msra.mxu1 %v1579_v43  ;;  %2599 = vmatprep.mubr.msk.bf16.mxu1 %vm3020_vm0, %v3019_v12  ;;  %v2667_v12 = vld [vmem:[#allocation15 + $0x10] sm:$0xff]  }
 0xb5c   :  { %2607 = vmatprep.subr.bf16.mxu0 %v2667_v12  ;;  %1945 = vmatprep.subr.bf16.mxu1 %v2675_v0 }
 0xb5d   :  { %2608 = vmatpush3.bf16.msra.mxu0 %v2667_v12 }
 0xb5e   :  { %2609 = vmatprep.subr.bf16.mxu0 %v2668_v19 }
 0xb61   :  { %2610 = vmatpush3.bf16.msra.mxu0 %v2668_v19 }
 0xb62   :  { %2600 = vmatmul.mubr.msk.bf16.vlgmr.msra.gmra.mrb[48].mxu1 %vm669_vm2, %v1577_v10  ;;  %2611 = vmatprep.subr.bf16.mxu0 %v2669_v23 }
 0xb63   :  { %1946 = vmatpush1.bf16.msra.mxu1 %v2673_v62 }
 0xb64   :  { %1947 = vmatprep.subr.bf16.mxu1 %v2678_v1 }
 0xb65   :  { %2612 = vmatpush3.bf16.msra.mxu0 %v2669_v23  ;;  %v2684_v23 = vld [vmem:[#allocation17 + $0x34] ss:$8 sps:$4 sm:$0xff]  }
 0xb66   :  { %2613 = vmatprep.subr.bf16.mxu0 %v2670_v54 }
 0xb67   :  { %1948 = vmatpush1.bf16.msra.mxu1 %v2676_v2  ;;  %v2305_v2 = vld [vmem:[%s3614_s13] ss:$0 sm:$0xff] }
 0xb69   :  { %2614 = vmatpush3.bf16.msra.mxu0 %v2670_v54  ;;  %v2687_v54 = vld [vmem:[#allocation17 + $0x44] ss:$8 sps:$4 sm:$0xff]  }
 0xb6a   :  { %2615 = vmatprep.subr.bf16.mxu0 %v2671_v27 }
 0xb6d   :  { %2616 = vmatpush3.bf16.msra.mxu0 %v2671_v27  ;;  %v2691_v27 = vld [vmem:[#allocation17 + $0x60] ss:$8 sps:$4 sm:$0xff]  }
 0xb6e   :  { %2617 = vmatprep.subr.bf16.mxu0 %v2672_v51 }
 0xb71   :  { %2618 = vmatpush3.bf16.msra.mxu0 %v2672_v51  ;;  %v2694_v51 = vld [vmem:[#allocation17 + $0x70] ss:$8 sps:$4 sm:$0xff]  }
 0xc15   :  { %v1112_v11 = vpop.f32.mrb[32].mxu1 }
 0xc16   :  { %v2553_v14 = vpop.f32.mrb[33].mxu1 }
 0xc17   :  { %v1115_v15 = vpop.f32.mrb[34].mxu1 }
 0xc18   :  { %v1119_v16 = vpack.c.bf16 %v1115_v15, %v1112_v11  ;;  %v2554_v17 = vpop.f32.mrb[35].mxu1 }
 0xc1a   :  { %1121 = vrot.lane.b32.xlu1 %v1119_v16, %s3021_s9 }
 0xc1d   :  { %v1238_v18 = vpop.f32.mrb[36].mxu1 }
 0xc1e   :  { %v2565_v20 = vpop.f32.mrb[37].mxu1 }
 0xc1f   :  { %v1241_v21 = vpop.f32.mrb[38].mxu1 }
 0xc20   :  { %v1245_v22 = vpack.c.bf16 %v1241_v21, %v1238_v18  ;;  %v2566_v53 = vpop.f32.mrb[39].mxu1 }
 0xc21   :  { %v2679_v53 = vld [vmem:[#allocation17 + $0x20] ss:$8 sps:$4 sm:$0xff]  }
 0xc22   :  { %1246 = vst.msk [vmem:[#allocation5 + $0x8] sm:$0xff] %vm621_vm1, %v1245_v22  ;;  %v2681_v22 = vld [vmem:[#allocation17 + $0x24] ss:$8 sps:$4 sm:$0xff]  }
 0xc23   :  { %1949 = vmatprep.subr.bf16.mxu1 %v2681_v22  ;;  %v2710_v22 = vld [vmem:[#allocation18 + $0x30] sm:$0xff]  }
 0xc24   :  { %1950 = vmatpush1.bf16.msra.mxu1 %v2679_v53  ;;  %v2711_v53 = vld [vmem:[#allocation18 + $0x78] sm:$0xff]  }
 0xc25   :  { %v1364_v39 = vpop.f32.mrb[40].mxu1  ;;  %1951 = vmatprep.subr.bf16.mxu1 %v2684_v23  ;;  %v1855_v23 = vlaneseq }
 0xc26   :  { %v2577_v24 = vpop.f32.mrb[41].mxu1 }
 0xc27   :  { %v1367_v55 = vpop.f32.mrb[42].mxu1  ;;  %v2685_v24 = vld [vmem:[#allocation17 + $0x40] ss:$8 sps:$4 sm:$0xff]  }
 0xc28   :  { %v1371_v25 = vpack.c.bf16 %v1367_v55, %v1364_v39  ;;  %v2578_v26 = vpop.f32.mrb[43].mxu1  ;;  %v2682_v39 = vld [vmem:[#allocation17 + $0x30] ss:$8 sps:$4 sm:$0xff]   ;;  %v2690_v55 = vld [vmem:[#allocation17 + $0x54] ss:$8 sps:$4 sm:$0xff]  }
 0xc29   :  { %1952 = vmatpush1.bf16.msra.mxu1 %v2682_v39  ;;  %v2693_v26 = vld [vmem:[#allocation17 + $0x64] ss:$8 sps:$4 sm:$0xff]  }
 0xc2a   :  { %1373 = vrot.lane.b32.xlu0 %v1371_v25, %s3022_s28  ;;  %1953 = vmatprep.subr.bf16.mxu1 %v2687_v54  ;;  %v2688_v25 = vld [vmem:[#allocation17 + $0x50] ss:$8 sps:$4 sm:$0xff]   ;;  %v1853_v54 = vld [vmem:[%s3616_s15] sm:$0x3] }
 0xc2d   :  { %v1491_v37 = vpop.f32.mrb[44].mxu1  ;;  %1954 = vmatpush1.bf16.msra.mxu1 %v2685_v24 }
 0xc2e   :  { %v2589_v28 = vpop.f32.mrb[45].mxu1  ;;  %1955 = vmatprep.subr.bf16.mxu1 %v2690_v55 }
 0xc2f   :  { %v1494_v60 = vpop.f32.mrb[46].mxu1  ;;  %v3023_v28 = vmov 0  }
 0xc30   :  { %v1498_v29 = vpack.c.bf16 %v1494_v60, %v1491_v37  ;;  %v2590_v30 = vpop.f32.mrb[47].mxu1  ;;  %v2696_v37 = vld [vmem:[#allocation17 + $0x74] ss:$8 sps:$4 sm:$0xff]   ;;  %1977 = vmatprep.mubr.bf16.mxu1 %v3023_v28  ;;  %v2697_v60 = vld [vmem:[#allocation18 + $0x40] sm:$0xff]  }
 0xc31   :  { %1956 = vmatpush1.bf16.msra.mxu1 %v2688_v25  ;;  %v2699_v30 = vld [vmem:[#allocation18 + $0x48] sm:$0xff]   ;;  %2419 = vmatprep.subr.bf16.mxu0 %v2697_v60 }
 0xc32   :  { %1500 = vrot.lane.b32.xlu0 %v1498_v29, %s3008_s23  ;;  %1957 = vmatprep.subr.bf16.mxu1 %v2693_v26  ;;  %v2698_v29 = vld [vmem:[#allocation18] sm:$0xff]  }
 0xc35   :  { %v1618_v31 = vpop.f32.mrb[48].mxu1  ;;  %1958 = vmatpush1.bf16.msra.mxu1 %v2691_v27 }
 0xc36   :  { %v2601_v32 = vpop.f32.mrb[49].mxu1  ;;  %1959 = vmatprep.subr.bf16.mxu1 %v2696_v37 }
 0xc37   :  { %v1621_v34 = vpop.f32.mrb[50].mxu1  ;;  %v2701_v32 = vld [vmem:[#allocation18 + $0x50] sm:$0xff]  }
 0xc38   :  { %v1625_v35 = vpack.c.bf16 %v1621_v34, %v1618_v31  ;;  %v2602_v38 = vpop.f32.mrb[51].mxu1  ;;  %v2700_v31 = vld [vmem:[#allocation18 + $0x8] sm:$0xff]   ;;  %v2702_v34 = vld [vmem:[#allocation18 + $0x10] sm:$0xff]  }
 0xc39   :  { %1960 = vmatpush1.bf16.msra.mxu1 %v2694_v51  ;;  %v2704_v38 = vld [vmem:[#allocation18 + $0x18] sm:$0xff]  }
 0xc3a   :  { %1627 = vrot.lane.b32.xlu1 %v1625_v35, %s3021_s9  ;;  %v2703_v35 = vld [vmem:[#allocation18 + $0x58] sm:$0xff]  }
 0xc8c   :  { %v1122_v4 = vpop.permute.xlu1 %1121 }
 0xc8d   :  { %1125 = vst.msk [vmem:[#allocation5] sm:$0xff] %vm1124_vm5, %v1122_v4  ;;  %v2705_v4 = vld [vmem:[#allocation18 + $0x60] sm:$0xff]  }
 0xc94   :  { %v1631_v6 = vld [vmem:[#allocation5] sm:$0xff] }
 0xc95   :  { %2619 = vmatprep.mubr.bf16.mxu0 %v1631_v6  ;;  %v2706_v6 = vld [vmem:[#allocation18 + $0x20] sm:$0xff]  }
 0xc9c   :  { %v1374_v7 = vpop.permute.xlu0 %1373 }
 0xc9d   :  { %1376 = vst.msk [vmem:[#allocation5 + $0x8] sm:$0xff] %vm868_vm3, %v1374_v7  ;;  %v2707_v7 = vld [vmem:[#allocation18 + $0x68] sm:$0xff]  }
 0xca4   :  { %v1501_v57 = vpop.permute.xlu0 %1500 }
 0xca5   :  { %1503 = vst.msk [vmem:[#allocation5 + $0x8] sm:$0xff] %vm996_vm4, %v1501_v57 }
 0xcac   :  { %v1628_v61 = vpop.permute.xlu1 %1627 }
 0xcad   :  { %1630 = vst.msk [vmem:[#allocation5 + $0x8] sm:$0xff] %vm1124_vm5, %v1628_v61 }
 0xcb4   :  { %v1632_v63 = vld [vmem:[#allocation5 + $0x8] sm:$0xff] }
 0xcb5   :  { %2620 = vmatmul.mubr.bf16.vlgmr.msra.gmra.mrb[24].mxu0 %v1632_v63 }
 0xcb6   :  { %2420 = vmatpush3.bf16.msra.mxu0 %v2698_v29 }
 0xcb7   :  { %2421 = vmatprep.subr.bf16.mxu0 %v2699_v30 }
 0xcba   :  { %2422 = vmatpush3.bf16.msra.mxu0 %v2700_v31 }
 0xcbb   :  { %2423 = vmatprep.subr.bf16.mxu0 %v2701_v32 }
 0xcbe   :  { %2424 = vmatpush3.bf16.msra.mxu0 %v2702_v34 }
 0xcbf   :  { %2425 = vmatprep.subr.bf16.mxu0 %v2703_v35 }
 0xcc2   :  { %2426 = vmatpush3.bf16.msra.mxu0 %v2704_v38 }
 0xcc3   :  { %2427 = vmatprep.subr.bf16.mxu0 %v2705_v4 }
 0xcc6   :  { %2428 = vmatpush3.bf16.msra.mxu0 %v2706_v6 }
 0xcc7   :  { %2429 = vmatprep.subr.bf16.mxu0 %v2707_v7 }
 0xd88   :  { %v2621_v41 = vpop.f32.mrb[24].mxu0 }
 0xd89   :  { %v1738_v36 = vpop.f32.mrb[25].mxu0  ;;  %v1747_v45 = vadd.f32 %v2621_v41, %v2295_v40 }
 0xd8a   :  { %v1739_v42 = vadd.f32 %v2295_v40, %v1738_v36  ;;  %v2622_v43 = vpop.f32.mrb[26].mxu0 }
 0xd8b   :  { %v1741_v44 = vpop.f32.mrb[27].mxu0  ;;  %v3539_v52 = vadd.f32 %v2795_v50, %v1747_v45  ;;  %v1750_v56 = vadd.f32 %v2622_v43, %v2295_v40  ;;  %v2304_v50 = vld [vmem:[%s3613_s12] ss:$0 sm:$0xff] }
 0xd8c   :  { %v3534_v46 = vadd.f32 %v2793_v33, %v1739_v42  ;;  %v1742_v47 = vadd.f32 %v2295_v40, %v1741_v44 }
 0xd8d   :  { %v3543_v59 = vadd.f32 %v2796_v58, %v1750_v56 }
 0xd8e   :  { %v3536_v49 = vadd.f32 %v2794_v48, %v1742_v47  ;;  %1763 = vadd.xlane.f32.xlu0 %v3534_v46 }
 0xd90   :  { %1765 = vadd.xlane.f32.xlu1 %v3536_v49 }
 0xd92   :  { %1767 = vadd.xlane.f32.xlu0 %v3539_v52 }
 0xd96   :  { %1769 = vadd.xlane.f32.xlu0 %v3543_v59 }
 0xe1b   :  { %v1764_v3 = vpop.xlane.xlu0 %1763 }
 0xe1c   :  { %v1771_v5 = vmul.f32 0.0078125, %v1764_v3 }
 0xe1d   :  { %v1766_v8 = vpop.xlane.xlu1 %1765 }
 0xe1e   :  { %v3547_v10 = vsub.f32 %v3534_v46, %v1771_v5  ;;  %v1772_v9 = vmul.f32 0.0078125, %v1766_v8 }
 0xe1f   :  { %v1768_v11 = vpop.xlane.xlu0 %1767 }
 0xe20   :  { %v3550_v13 = vsub.f32 %v3536_v49, %v1772_v9  ;;  %v1773_v14 = vmul.f32 0.0078125, %v1768_v11  ;;  %v1779_v15 = vmul.f32 %v3547_v10, %v3547_v10 }
 0xe22   :  { %v3555_v16 = vsub.f32 %v3539_v52, %v1773_v14  ;;  %1783 = vadd.xlane.f32.xlu0 %v1779_v15  ;;  %v1780_v17 = vmul.f32 %v3550_v13, %v3550_v13 }
 0xe23   :  { %v1770_v12 = vpop.xlane.xlu0 %1769 }
 0xe24   :  { %v1774_v18 = vmul.f32 0.0078125, %v1770_v12  ;;  %1785 = vadd.xlane.f32.xlu1 %v1780_v17  ;;  %v1781_v19 = vmul.f32 %v3555_v16, %v3555_v16 }
 0xe26   :  { %v3562_v20 = vsub.f32 %v3543_v59, %v1774_v18  ;;  %1787 = vadd.xlane.f32.xlu0 %v1781_v19  ;;  %v2708_v19 = vld [vmem:[#allocation18 + $0x28] sm:$0xff]  }
 0xe27   :  { %2430 = vmatpush3.bf16.msra.mxu0 %v2708_v19 }
 0xe28   :  { %v1782_v21 = vmul.f32 %v3562_v20, %v3562_v20 }
 0xe2a   :  { %1789 = vadd.xlane.f32.xlu1 %v1782_v21  ;;  %v2709_v21 = vld [vmem:[#allocation18 + $0x70] sm:$0xff]  }
 0xe2b   :  { %2431 = vmatprep.subr.bf16.mxu0 %v2709_v21 }
 0xe2c   :  { %2432 = vmatpush3.bf16.msra.mxu0 %v2710_v22 }
 0xe2d   :  { %2433 = vmatprep.subr.bf16.mxu0 %v2711_v53 }
 0xeaf   :  { %v1784_v57 = vpop.xlane.xlu0 %1783 }
 0xeb0   :  { %v1791_v61 = vmul.f32 0.0078125, %v1784_v57 }
 0xeb1   :  { %v1786_v63 = vpop.xlane.xlu1 %1785 }
 0xeb2   :  { %v1795_v40 = vadd.f32 1e-06, %v1791_v61  ;;  %v1792_v41 = vmul.f32 0.0078125, %v1786_v63 }
 0xeb3   :  { %v1788_v36 = vpop.xlane.xlu0 %1787 }
 0xeb4   :  { %2785 = vrsqrt.f32 %v1795_v40  ;;  %v1796_v42 = vadd.f32 1e-06, %v1792_v41  ;;  %v1793_v43 = vmul.f32 0.0078125, %v1788_v36 }
 0xeb6   :  { %2787 = vrsqrt.f32 %v1796_v42  ;;  %v1797_v44 = vadd.f32 1e-06, %v1793_v43 }
 0xeb7   :  { %v1790_v45 = vpop.xlane.xlu1 %1789 }
 0xeb8   :  { %2789 = vrsqrt.f32 %v1797_v44  ;;  %v1794_v33 = vmul.f32 0.0078125, %v1790_v45 }
 0xeba   :  { %v1798_v47 = vadd.f32 1e-06, %v1794_v33 }
 0xebc   :  { %2791 = vrsqrt.f32 %v1798_v47 }
 0xebe   :  { %v2786_v48 = vpop.eup %2785 }
 0xebf   :  { %v1803_v56 = vmul.f32 %v2786_v48, %v3547_v10 }
 0xec0   :  { %v2788_v58 = vpop.eup %2787 }
 0xec1   :  { %v1804_v62 = vmul.f32 %v2788_v58, %v3550_v13  ;;  %v1813_v0 = vmul.f32 %v2304_v50, %v1803_v56  ;;  %v2338_v56 = vld [vmem:[%s3631_s2] ss:$0 sm:$0xff] }
 0xec2   :  { %v2790_v1 = vpop.eup %2789 }
 0xec3   :  { %v1814_v3 = vmul.f32 %v2304_v50, %v1804_v62  ;;  %v1823_v5 = vadd.f32 %v2305_v2, %v1813_v0  ;;  %v1805_v9 = vmul.f32 %v2790_v1, %v3555_v16  ;;  %v2712_v16 = vld [vmem:[#allocation18 + $0x38] sm:$0xff]  }
 0xec4   :  { %2434 = vmatpush3.bf16.msra.mxu0 %v2712_v16 }
 0xec5   :  { %v1824_v8 = vadd.f32 %v2305_v2, %v1814_v3  ;;  %v1815_v10 = vmul.f32 %v2304_v50, %v1805_v9 }
 0xec6   :  { %v2792_v11 = vpop.eup %2791 }
 0xec7   :  { %v1827_v14 = vpack.c.bf16 %v1824_v8, %v1823_v5  ;;  %v1806_v15 = vmul.f32 %v2792_v11, %v3562_v20  ;;  %v1825_v12 = vadd.f32 %v2305_v2, %v1815_v10  ;;  %v1856_v20 = vshrl.u32 %v1855_v23, 7 }
 0xec9   :  { %1978 = vmatmul.mubr.bf16.vlgmr.msra.gmra.mrb[52].mxu1 %v1827_v14  ;;  %v1816_v17 = vmul.f32 %v2304_v50, %v1806_v15  ;;  %v1857_v39 = vsub.s32 0, %v1856_v20  ;;  %v1861_v24 = vsub.s32 1, %v1856_v20 }
 0xeca   :  { %1987 = vmatprep.mubr.bf16.mxu1 %v3023_v28 }
 0xecb   :  { %v1826_v13 = vadd.f32 %v2305_v2, %v1816_v17  ;;  %v1858_v55 = vrot.slane %v1853_v54, %v1857_v39  ;;  %v1862_v25 = vrot.slane %v1853_v54, %v1861_v24 }
 0xecd   :  { %v1828_v18 = vpack.c.bf16 %v1826_v13, %v1825_v12 }
 0xed1   :  { %1988 = vmatmul.mubr.bf16.gmra.mrb[56].mxu1 %v1828_v18 }
 0xf9c   :  { %v1979_v26 = vpop.f32.mrb[52].mxu1 }
 0xf9d   :  { %v1980_v27 = vadd.f32 %v1979_v26, %v1858_v55  ;;  %v1981_v37 = vpop.f32.mrb[53].mxu1 }
 0xf9e   :  { %v1982_v51 = vadd.f32 %v1981_v37, %v1862_v25  ;;  %v1983_v28 = vpop.f32.mrb[54].mxu1 }
 0xf9f   :  { %v1984_v60 = vadd.f32 %v1983_v28, %v1858_v55  ;;  %v1985_v29 = vpop.f32.mrb[55].mxu1  ;;  %v1998_v31 = vmax.f32 %v1980_v27, 0.0 }
 0xfa0   :  { %v1986_v30 = vadd.f32 %v1985_v29, %v1862_v25  ;;  %v1999_v34 = vmax.f32 %v1982_v51, 0.0 }
 0xfa1   :  { %v2000_v32 = vmax.f32 %v1984_v60, 0.0 }
 0xfa2   :  { %v2001_v35 = vmax.f32 %v1986_v30, 0.0 }
 0xfa3   :  { %v2010_v38 = vpack.c.bf16 %v2000_v32, %v1998_v31 }
 0xfa4   :  { %v2011_v4 = vpack.c.bf16 %v2001_v35, %v1999_v34  ;;  %v1989_v6 = vpop.f32.mrb[56].mxu1 }
 0xfa5   :  { %v1990_v7 = vadd.f32 %v1989_v6, %v1858_v55  ;;  %v1991_v57 = vpop.f32.mrb[57].mxu1 }
 0xfa6   :  { %v1992_v61 = vadd.f32 %v1991_v57, %v1862_v25  ;;  %v1993_v63 = vpop.f32.mrb[58].mxu1  ;;  %2174 = vmatprep.mubr.bf16.mxu0 %v2011_v4 }
 0xfa7   :  { %v1994_v40 = vadd.f32 %v1993_v63, %v1858_v55  ;;  %v1995_v41 = vpop.f32.mrb[59].mxu1  ;;  %2175 = vmatmul.mubr.bf16.vlgmr.msra.gmra.mrb[28].mxu0 %v2010_v38  ;;  %v2002_v42 = vmax.f32 %v1990_v7, 0.0 }
 0xfa8   :  { %v1996_v36 = vadd.f32 %v1995_v41, %v1862_v25  ;;  %v2003_v44 = vmax.f32 %v1992_v61, 0.0 }
 0xfa9   :  { %v2004_v43 = vmax.f32 %v1994_v40, 0.0 }
 0xfaa   :  { %v2005_v45 = vmax.f32 %v1996_v36, 0.0 }
 0xfab   :  { %v2012_v33 = vpack.c.bf16 %v2004_v43, %v2002_v42 }
 0xfac   :  { %v2013_v47 = vpack.c.bf16 %v2005_v45, %v2003_v44 }
 0xfae   :  { %2182 = vmatprep.mubr.bf16.mxu0 %v2013_v47 }
 0xfaf   :  { %2183 = vmatmul.mubr.bf16.gmra.mrb[32].mxu0 %v2012_v33 }
0x107a   :  { %v2435_v48 = vpop.f32.mrb[28].mxu0 }
0x107b   :  { %v2436_v50 = vpop.f32.mrb[29].mxu0 }
0x107c   :  { %v2437_v58 = vadd.f32 %v2436_v50, %v2435_v48  ;;  %v2438_v62 = vpop.f32.mrb[30].mxu0 }
0x107d   :  { %v2439_v0 = vpop.f32.mrb[31].mxu0 }
0x107e   :  { %v2213_v1 = vadd.f32 %v2437_v58, %v2338_v56  ;;  %v2440_v2 = vadd.f32 %v2439_v0, %v2438_v62 }
0x1080   :  { %v2221_v3 = vadd.f32 %v2213_v1, %v3534_v46  ;;  %v2214_v5 = vadd.f32 %v2440_v2, %v2338_v56 }
0x1082   :  { %2225 = vst [vmem:[#allocation20] sm:$0xff] %v2221_v3  ;;  %v2222_v8 = vadd.f32 %v2214_v5, %v3536_v49  ;;  %v2441_v9 = vpop.f32.mrb[32].mxu0 }
0x1083   :  { %v2442_v11 = vpop.f32.mrb[33].mxu0 }
0x1084   :  { %2226 = vst [vmem:[#allocation20 + $0x8] sm:$0xff] %v2222_v8  ;;  %v2443_v14 = vadd.f32 %v2442_v11, %v2441_v9  ;;  %v2444_v15 = vpop.f32.mrb[34].mxu0 }
0x1085   :  { %v2445_v10 = vpop.f32.mrb[35].mxu0 }
0x1086   :  { %v2215_v17 = vadd.f32 %v2443_v14, %v2338_v56  ;;  %v2446_v13 = vadd.f32 %v2445_v10, %v2444_v15 }
0x1088   :  { %v2223_v12 = vadd.f32 %v2215_v17, %v3539_v52  ;;  %v2216_v18 = vadd.f32 %v2446_v13, %v2338_v56 }
0x108a   :  { %2227 = vst [vmem:[#allocation20 + $0x10] sm:$0xff] %v2223_v12  ;;  %v2224_v46 = vadd.f32 %v2216_v18, %v3543_v59 }
0x108c   :  { %2228 = vst [vmem:[#allocation20 + $0x18] sm:$0xff] %v2224_v46 }
0x108d   :  { %2984 = shalt.err (!%p2981_p12)
}
0x108e   :  { %s3632_s16 = sld [smem:[#allocation31_spill]] }
0x1094   :  { %s2985_s24 = scalar_lea.hbm %s3632_s16, 512 }
0x1095   :  { %p2986_p13 = scmp.ne.s32.totalorder %s3632_s16, %s2985_s24  ;;  %p2989_p0 = scmp.lt.u32.totalorder %s2985_s24, %s3632_s16 }
0x1097   :  { %p2991_p1 = pnand %p2989_p0, %p2986_p13 }
0x1099   :  { %2994 = shalt.err (!%p2991_p1)
}
0x109a   :  { %2240 = dma.vmem_to_hbm [thread:$0]  %s2235_s21, 512, %s3632_s16, [#allocation8], %s3013_s10, %s3013_s10, %s3014_s19  }
0x109b   :  { %3005 = dma.done.wait [#allocation8], 512  }
0x109c   :  { %3006 = vsyncadd [#allocation8], 4294966784 }
0x109d   :  { %2244 = vsyncpa [#allocation7], 1 }
0x109e   :  { %2245 = vsyncpa [#allocation10], 1 }
0x109f   :  { %2246 = vsyncpa [#allocation13], 1 }
0x10a0   :  { %2247 = vsyncpa [#allocation16], 1 }
0x10a1   :  { %2248 = vsyncpa [#allocation19], 1 }
0x10a2   :  { %2249 = vsyncpa [#allocation8], 1 }

</bundles_post_ra>
